<compile_context>
chip_gen: v7x
topology: tpu7x:2x2x1
jax: 0.10.0
libtpu: 0.0.40
codegen_flags: <defaults>
</compile_context>

<pallas_src>
import functools

import jax
import jax.numpy as jnp
from jax.experimental import pallas as pl
from jax.experimental.pallas import tpu as pltpu

D_MODEL = 96            # d_model of the encoder layer
C_PAD = 128             # lane-padded channel width
NHEAD = 3               # nhead
HEAD_DIM = D_MODEL // NHEAD
QKV_PAD = 384           # 3*D_MODEL = 288, lane-padded to 3*128
DIM_FF = 2048           # default dim_feedforward of nn.TransformerEncoderLayer
FF_CHUNK = 512          # FFN chunk along DIM_FF (4 chunks)
LN_EPS = 1e-5


# ----------------------------- kernel ---------------------------------------

def _layernorm(u, gamma, beta, lane_mask):
    """LayerNorm over the first D_MODEL lanes of a lane-padded (m, C_PAD) slab.

    Requires u's pad lanes to be exactly zero (see invariant above).  Uses the
    two-pass (u-mu)^2 variance; `lane_mask` re-zeroes the pad lanes of (u-mu).
    """
    mu = jnp.sum(u, axis=-1, keepdims=True) * (1.0 / D_MODEL)
    diff = (u - mu) * lane_mask
    var = jnp.sum(diff * diff, axis=-1, keepdims=True) * (1.0 / D_MODEL)
    # gamma/beta pad lanes are zero, so output pad lanes stay zero.
    return diff * jax.lax.rsqrt(var + LN_EPS) * gamma + beta


def _encoder_kernel(x_ref,
                    w_qkv_ref, b_qkv_ref, wo_ref, bo_ref,
                    ln1_g_ref, ln1_b_ref,
                    w1_ref, b1_ref, w2_ref, b2_ref,
                    ln2_g_ref, ln2_b_ref,
                    lnx_g_ref, lnx_b_ref,
                    out_ref, *, bt, t, width):
    """Post-norm TransformerEncoderLayer for a (bt, t, C_PAD) block."""
    m = bt * t
    x = x_ref[...].reshape(m, C_PAD)           # f32, pad lanes are zero
    xb = x.astype(jnp.bfloat16)                # MXU operand

    # Lane-validity mask for LayerNorm (first D_MODEL lanes are real channels).
    lane = jax.lax.broadcasted_iota(jnp.int32, (1, C_PAD), 1)
    lane_mask = (lane < D_MODEL).astype(jnp.float32)

    # Banded additive mask, built in-kernel (no O(T^2) DMA).  -1e30 instead of
    # -inf is safe because the diagonal is always unmasked (no fully-masked row).
    if width is not None:
        half = (width - 1) // 2
        ii = jax.lax.broadcasted_iota(jnp.int32, (t, t), 0)
        jj = jax.lax.broadcasted_iota(jnp.int32, (t, t), 1)
        band = jnp.where(jnp.abs(ii - jj) <= half,
                         jnp.float32(0.0), jnp.float32(-1e30))
        mask_b = jnp.broadcast_to(band[None, :, :], (bt, t, t))   # hoisted once

    # --- fused QKV projection: one (m, C_PAD) @ (C_PAD, QKV_PAD) matmul ------
    # Column layout: [ Wq(96) | Wk(96) | Wv(96) | zeros(96) ];
    # 1/sqrt(head_dim) already folded into the Q block and bias on the host.
    qkv = jnp.dot(xb, w_qkv_ref[...],
                  preferred_element_type=jnp.float32) + b_qkv_ref[...]   # (m, 384)

    # --- multi-head self attention (tiny batched matmuls, bf16 operands) -----
    o_parts = []
    for h in range(NHEAD):                     # static 3-iter loop: only tiny ops
        q_off = h * HEAD_DIM
        k_off = D_MODEL + h * HEAD_DIM
        v_off = 2 * D_MODEL + h * HEAD_DIM
        q3 = qkv[:, q_off:q_off + HEAD_DIM].reshape(bt, t, HEAD_DIM).astype(jnp.bfloat16)
        k3 = qkv[:, k_off:k_off + HEAD_DIM].reshape(bt, t, HEAD_DIM).astype(jnp.bfloat16)
        v3 = qkv[:, v_off:v_off + HEAD_DIM].reshape(bt, t, HEAD_DIM).astype(jnp.bfloat16)

        s = jnp.einsum('bqd,bkd->bqk', q3, k3,
                       preferred_element_type=jnp.float32)           # (bt, t, t)
        if width is not None:
            s = s + mask_b
        s = s - jnp.max(s, axis=-1, keepdims=True)
        p = jnp.exp(s)
        # approx reciprocal runs on the EUP (~1e-3 rel err/row, within tolerance)
        p = p * pl.reciprocal(jnp.sum(p, axis=-1, keepdims=True), approx=True)
        o3 = jnp.einsum('bqk,bkd->bqd', p.astype(jnp.bfloat16), v3,
                        preferred_element_type=jnp.float32)          # (bt, t, 32)
        o_parts.append(o3.reshape(m, HEAD_DIM).astype(jnp.bfloat16))

    # --- fused output projection: one (m, 3*HEAD_DIM) @ (96, C_PAD) matmul ---
    o_flat = jnp.concatenate(o_parts, axis=-1)                       # (m, 96)
    attn = jnp.dot(o_flat, wo_ref[...],
                   preferred_element_type=jnp.float32) + bo_ref[...]

    # --- residual + norm1 ---
    y = _layernorm(x + attn, ln1_g_ref[...], ln1_b_ref[...], lane_mask)

    # --- feed-forward (ReLU), chunked over DIM_FF to bound live intermediates -
    yb = y.astype(jnp.bfloat16)
    h2 = jnp.zeros((m, C_PAD), jnp.float32)
    for c0 in range(0, DIM_FF, FF_CHUNK):
        h1c = jnp.dot(yb, w1_ref[:, c0:c0 + FF_CHUNK],
                      preferred_element_type=jnp.float32) + b1_ref[:, c0:c0 + FF_CHUNK]
        h1c = jnp.maximum(h1c, 0.0).astype(jnp.bfloat16)   # post-ReLU straight to bf16
        h2 = h2 + jnp.dot(h1c, w2_ref[c0:c0 + FF_CHUNK, :],
                          preferred_element_type=jnp.float32)
    h2 = h2 + b2_ref[...]

    # --- residual + norm2 ---
    z = _layernorm(y + h2, ln2_g_ref[...], ln2_b_ref[...], lane_mask)

    # --- extra self.layernorm (only on the `width is not None` branch) ---
    if width is not None:
        z = _layernorm(z, lnx_g_ref[...], lnx_b_ref[...], lane_mask)

    out_ref[...] = z.reshape(bt, t, C_PAD).astype(out_ref.dtype)


# ----------------------------- wrapper ---------------------------------------

def _pack_params(p):
    """Host-side packing: fused QKV / out-proj weights, lane padding, bf16 cast."""
    scale = 1.0 / (HEAD_DIM ** 0.5)
    pad_cols = lambda w: jnp.pad(w, ((0, 0), (0, C_PAD - D_MODEL)))
    pad_vec = lambda v: jnp.pad(v, (0, C_PAD - D_MODEL)).reshape(1, C_PAD)

    # Fused QKV weight: (96, 288) -> lane/sublane padded (128, 384), bf16.
    w_qkv = jnp.concatenate([p['wq_t'] * scale, p['wk_t'], p['wv_t']], axis=1)
    w_qkv = jnp.pad(w_qkv, ((0, C_PAD - D_MODEL), (0, QKV_PAD - 3 * D_MODEL)))
    b_qkv = jnp.concatenate([p['bq'] * scale, p['bk'], p['bv']])
    b_qkv = jnp.pad(b_qkv, (0, QKV_PAD - 3 * D_MODEL)).reshape(1, QKV_PAD)

    return dict(
        w_qkv=w_qkv.astype(jnp.bfloat16),
        b_qkv=b_qkv,
        wo=pad_cols(p['wo_t']).astype(jnp.bfloat16),    # (96, 128)
        bo=pad_vec(p['bo']),
        ln1_g=pad_vec(p['ln1_g']), ln1_b=pad_vec(p['ln1_b']),
        w1=jnp.pad(p['w1_t'], ((0, C_PAD - D_MODEL), (0, 0))).astype(jnp.bfloat16),
        b1=p['b1'].reshape(1, DIM_FF),
        w2=pad_cols(p['w2_t']).astype(jnp.bfloat16),
        b2=pad_vec(p['b2']),
        ln2_g=pad_vec(p['ln2_g']), ln2_b=pad_vec(p['ln2_b']),
        lnx_g=pad_vec(p['lnx_g']), lnx_b=pad_vec(p['lnx_b']),
    )


def _choose_bt(B, T, target_rows):
    """Batch block size: prefer exact divisors of B (no padded garbage rows),
    keep >=2 grid steps when B allows (v7x has 2 TensorCores), fall back to
    minimal padding only if no divisor comes close to the target M width."""
    cap = max(1, min(B, max(1, target_rows // max(T, 1))))
    divisors = [d for d in range(1, cap + 1) if B % d == 0]
    bt = max(divisors)
    if bt * 2 <= cap:                       # best divisor badly underfeeds the MXU
        for d in range(cap, bt, -1):
            if (-B) % d <= max(1, B // 8):  # allow <=12.5% padded batch rows
                bt = d
                break
    if bt == B and B > 1:                   # guarantee >=2 grid steps
        smaller = [d for d in divisors if d * 2 <= B]
        bt = max(smaller) if smaller else max(1, B // 2)
    return bt


def transformer_forward(x_bct, params, width=None, target_rows=512):
    """x_bct: (B, C=96, T) float array. Returns (B, 96, T), matching the module."""
    B, C, T = x_bct.shape
    assert C == D_MODEL, "channel dim must equal d_model=96"

    bt = _choose_bt(B, T, target_rows)
    b_pad = -(-B // bt) * bt

    x_btc = jnp.transpose(x_bct, (0, 2, 1)).astype(jnp.float32)        # (B, T, C)
    x_p = jnp.pad(x_btc, ((0, b_pad - B), (0, 0), (0, C_PAD - C)))     # lane-pad

    pk = _pack_params(params)
    args = (x_p,
            pk['w_qkv'], pk['b_qkv'], pk['wo'], pk['bo'],
            pk['ln1_g'], pk['ln1_b'],
            pk['w1'], pk['b1'], pk['w2'], pk['b2'],
            pk['ln2_g'], pk['ln2_b'],
            pk['lnx_g'], pk['lnx_b'])

    def const_spec(a):
        nd = a.ndim
        return pl.BlockSpec(a.shape, lambda b, _nd=nd: (0,) * _nd)

    in_specs = [pl.BlockSpec((bt, T, C_PAD), lambda b: (b, 0, 0))]
    in_specs += [const_spec(a) for a in args[1:]]

    out = pl.pallas_call(
        functools.partial(_encoder_kernel, bt=bt, t=T, width=width),
        out_shape=jax.ShapeDtypeStruct((b_pad, T, C_PAD), jnp.float32),
        grid=(b_pad // bt,),
        in_specs=in_specs,
        out_specs=pl.BlockSpec((bt, T, C_PAD), lambda b: (b, 0, 0)),
        compiler_params=pltpu.CompilerParams(dimension_semantics=("parallel",)),
    )(*args)

    # un-pad batch & channels, back to (B, C, T)
    return jnp.transpose(out[:B, :, :C], (0, 2, 1))


# ----------------------------- params & reference ----------------------------

def init_params(key):
    ks = jax.random.split(key, 20)
    nrm = lambda k, shp, s: jax.random.normal(k, shp, jnp.float32) * s
    wq = nrm(ks[0], (D_MODEL, D_MODEL), 0.05)
    wk = nrm(ks[1], (D_MODEL, D_MODEL), 0.05)
    wv = nrm(ks[2], (D_MODEL, D_MODEL), 0.05)
    wo = nrm(ks[3], (D_MODEL, D_MODEL), 0.05)
    w1 = nrm(ks[4], (DIM_FF, D_MODEL), 0.05)
    w2 = nrm(ks[5], (D_MODEL, DIM_FF), 0.05)
    return dict(
        # torch Linear computes x @ W.T, so store transposed weights
        wq_t=wq.T, wk_t=wk.T, wv_t=wv.T, wo_t=wo.T, w1_t=w1.T, w2_t=w2.T,
        bq=nrm(ks[6], (D_MODEL,), 0.02), bk=nrm(ks[7], (D_MODEL,), 0.02),
        bv=nrm(ks[8], (D_MODEL,), 0.02), bo=nrm(ks[9], (D_MODEL,), 0.02),
        b1=nrm(ks[10], (DIM_FF,), 0.02), b2=nrm(ks[11], (D_MODEL,), 0.02),
        ln1_g=1.0 + nrm(ks[12], (D_MODEL,), 0.01), ln1_b=nrm(ks[13], (D_MODEL,), 0.01),
        ln2_g=1.0 + nrm(ks[14], (D_MODEL,), 0.01), ln2_b=nrm(ks[15], (D_MODEL,), 0.01),
        lnx_g=1.0 + nrm(ks[16], (D_MODEL,), 0.01), lnx_b=nrm(ks[17], (D_MODEL,), 0.01),
    )


def build_attn_mask(T, width):
    """Banded additive mask, exactly mirroring the PyTorch loop (reference only)."""
    mk = jnp.eye(T, dtype=jnp.float32)
    for i in range((width - 1) // 2):
        idx = jnp.arange(0, T - 1 - i)
        mk = mk.at[idx, idx + 1 + i].set(1.0)
        mk = mk.at[idx + 1 + i, idx].set(1.0)
    return jnp.where(mk == 0.0, -jnp.inf, 0.0)


def reference_forward(x_bct, p, width=None):
    """Pure-JAX f32 reference (independent of the kernel implementation)."""
    x = jnp.transpose(x_bct, (0, 2, 1)).astype(jnp.float32)   # (B, T, C)
    B, T, C = x.shape
    mask = jnp.zeros((T, T), jnp.float32) if width is None else build_attn_mask(T, width)

    q = x @ p['wq_t'] + p['bq']
    k = x @ p['wk_t'] + p['bk']
    v = x @ p['wv_t'] + p['bv']
    qh = q.reshape(B, T, NHEAD, HEAD_DIM)
    kh = k.reshape(B, T, NHEAD, HEAD_DIM)
    vh = v.reshape(B, T, NHEAD, HEAD_DIM)
    s = jnp.einsum('bthd,bshd->bhts', qh, kh) / jnp.sqrt(jnp.float32(HEAD_DIM)) + mask
    a = jax.nn.softmax(s, axis=-1)
    o = jnp.einsum('bhts,bshd->bthd', a, vh).reshape(B, T, C)
    o = o @ p['wo_t'] + p['bo']

    def ln(u, g, b):
        mu = jnp.mean(u, axis=-1, keepdims=True)
        var = jnp.mean((u - mu) ** 2, axis=-1, keepdims=True)
        return (u - mu) / jnp.sqrt(var + LN_EPS) * g + b

    y = ln(x + o, p['ln1_g'], p['ln1_b'])
    h = jax.nn.relu(y @ p['w1_t'] + p['b1'])
    z = ln(y + (h @ p['w2_t'] + p['b2']), p['ln2_g'], p['ln2_b'])
    if width is not None:
        z = ln(z, p['lnx_g'], p['lnx_b'])
    return jnp.transpose(z, (0, 2, 1))


# ----------------------------- main ------------------------------------------

if __name__ == "__main__":
    key = jax.random.PRNGKey(0)
    kx, kp = jax.random.split(key)

    B, T = 2, 16
    x = jax.random.normal(kx, (B, D_MODEL, T), jnp.float32)   # (B, C=96, T)
    params = init_params(kp)

    # width=None path (no mask, no extra layernorm)
    out_none = transformer_forward(x, params, width=None)
    jax.block_until_ready(out_none)
    # width=5 path (banded mask + extra layernorm)
    out_band = transformer_forward(x, params, width=5)
    jax.block_until_ready(out_band)

    with jax.default_matmul_precision('highest'):
        ref_none = reference_forward(x, params, width=None)
        ref_band = reference_forward(x, params, width=5)

    assert out_none.shape == (B, D_MODEL, T)
    assert out_band.shape == (B, D_MODEL, T)
    # Tolerance accounts for bf16 MXU operands (f32 accumulation, f32 LN/softmax).
    assert bool(jnp.allclose(out_none, ref_none, atol=5e-2, rtol=5e-2)), "width=None mismatch"
    assert bool(jnp.allclose(out_band, ref_band, atol=5e-2, rtol=5e-2)), "width=5 mismatch"

    print("KERNEL_OK")
</pallas_src>

<mosaic_0001>
module attributes {stable_mosaic.version = 11 : i64} {
  func.func @_encoder_kernel(%arg0: i32, %arg1: memref<1x16x128xf32, #tpu.memory_space<vmem>>, %arg2: memref<128x384xbf16, #tpu.memory_space<vmem>>, %arg3: memref<1x384xf32, #tpu.memory_space<vmem>>, %arg4: memref<96x128xbf16, #tpu.memory_space<vmem>>, %arg5: memref<1x128xf32, #tpu.memory_space<vmem>>, %arg6: memref<1x128xf32, #tpu.memory_space<vmem>>, %arg7: memref<1x128xf32, #tpu.memory_space<vmem>>, %arg8: memref<128x2048xbf16, #tpu.memory_space<vmem>>, %arg9: memref<1x2048xf32, #tpu.memory_space<vmem>>, %arg10: memref<2048x128xbf16, #tpu.memory_space<vmem>>, %arg11: memref<1x128xf32, #tpu.memory_space<vmem>>, %arg12: memref<1x128xf32, #tpu.memory_space<vmem>>, %arg13: memref<1x128xf32, #tpu.memory_space<vmem>>, %arg14: memref<1x128xf32, #tpu.memory_space<vmem>>, %arg15: memref<1x128xf32, #tpu.memory_space<vmem>>, %arg16: memref<1x16x128xf32, #tpu.memory_space<vmem>>) attributes {dimension_semantics = [#tpu.dimension_semantics<parallel>], iteration_bounds = array<i64: 2>, scalar_prefetch = 0 : i64, scratch_operands = 0 : i64, tpu.core_type = #tpu.core_type<tc>, window_params = [{transform_indices = @transform_0, window_bounds = array<i64: 1, 16, 128>}, {pipeline_mode = #tpu.pipeline_mode<synchronous>, transform_indices = @transform_1, window_bounds = array<i64: 128, 384>}, {pipeline_mode = #tpu.pipeline_mode<synchronous>, transform_indices = @transform_2, window_bounds = array<i64: 1, 384>}, {pipeline_mode = #tpu.pipeline_mode<synchronous>, transform_indices = @transform_3, window_bounds = array<i64: 96, 128>}, {pipeline_mode = #tpu.pipeline_mode<synchronous>, transform_indices = @transform_4, window_bounds = array<i64: 1, 128>}, {pipeline_mode = #tpu.pipeline_mode<synchronous>, transform_indices = @transform_5, window_bounds = array<i64: 1, 128>}, {pipeline_mode = #tpu.pipeline_mode<synchronous>, transform_indices = @transform_6, window_bounds = array<i64: 1, 128>}, {pipeline_mode = #tpu.pipeline_mode<synchronous>, transform_indices = @transform_7, window_bounds = array<i64: 128, 2048>}, {pipeline_mode = #tpu.pipeline_mode<synchronous>, transform_indices = @transform_8, window_bounds = array<i64: 1, 2048>}, {pipeline_mode = #tpu.pipeline_mode<synchronous>, transform_indices = @transform_9, window_bounds = array<i64: 2048, 128>}, {pipeline_mode = #tpu.pipeline_mode<synchronous>, transform_indices = @transform_10, window_bounds = array<i64: 1, 128>}, {pipeline_mode = #tpu.pipeline_mode<synchronous>, transform_indices = @transform_11, window_bounds = array<i64: 1, 128>}, {pipeline_mode = #tpu.pipeline_mode<synchronous>, transform_indices = @transform_12, window_bounds = array<i64: 1, 128>}, {pipeline_mode = #tpu.pipeline_mode<synchronous>, transform_indices = @transform_13, window_bounds = array<i64: 1, 128>}, {pipeline_mode = #tpu.pipeline_mode<synchronous>, transform_indices = @transform_14, window_bounds = array<i64: 1, 128>}, {transform_indices = @transform_15, window_bounds = array<i64: 1, 16, 128>}]} {
    %c0 = arith.constant 0 : index
    %c0_0 = arith.constant 0 : index
    %c0_1 = arith.constant 0 : index
    %0 = vector.load %arg1[%c0, %c0_0, %c0_1] : memref<1x16x128xf32, #tpu.memory_space<vmem>>, vector<1x16x128xf32>
    %1 = vector.shape_cast %0 : vector<1x16x128xf32> to vector<16x128xf32>
    %2 = arith.truncf %1 : vector<16x128xf32> to vector<16x128xbf16>
    %3 = tpu.iota {dimensions = array<i32: 1>} : vector<1x128xi32>
    %c96_i32 = arith.constant 96 : i32
    %4 = vector.broadcast %c96_i32 : i32 to vector<1x128xi32>
    %5 = arith.cmpi slt, %3, %4 : vector<1x128xi32>
    %6 = arith.extui %5 : vector<1x128xi1> to vector<1x128xi32>
    %7 = arith.sitofp %6 : vector<1x128xi32> to vector<1x128xf32>
    %c0_2 = arith.constant 0 : index
    %c0_3 = arith.constant 0 : index
    %8 = vector.load %arg2[%c0_2, %c0_3] : memref<128x384xbf16, #tpu.memory_space<vmem>>, vector<128x384xbf16>
    %cst = arith.constant dense<0.000000e+00> : vector<16x384xf32>
    %9 = tpu.matmul %2, %8, %cst {dimension_numbers = #tpu.dot_dimension_numbers<[1], [0], [0], [1], [0, 0, 1, 1], [], []>} : vector<16x128xbf16>, vector<128x384xbf16>, vector<16x384xf32> -> vector<16x384xf32>
    %c0_4 = arith.constant 0 : index
    %c0_5 = arith.constant 0 : index
    %10 = vector.load %arg3[%c0_4, %c0_5] : memref<1x384xf32, #tpu.memory_space<vmem>>, vector<1x384xf32>
    %11 = vector.broadcast %10 : vector<1x384xf32> to vector<16x384xf32>
    %12 = arith.addf %9, %11 : vector<16x384xf32>
    %13 = vector.extract_strided_slice %12 {offsets = [0, 0], sizes = [16, 32], strides = [1, 1]} : vector<16x384xf32> to vector<16x32xf32>
    %14 = vector.shape_cast %13 : vector<16x32xf32> to vector<1x16x32xf32>
    %15 = arith.truncf %14 : vector<1x16x32xf32> to vector<1x16x32xbf16>
    %16 = vector.extract_strided_slice %12 {offsets = [0, 96], sizes = [16, 32], strides = [1, 1]} : vector<16x384xf32> to vector<16x32xf32>
    %17 = vector.shape_cast %16 : vector<16x32xf32> to vector<1x16x32xf32>
    %18 = arith.truncf %17 : vector<1x16x32xf32> to vector<1x16x32xbf16>
    %19 = vector.extract_strided_slice %12 {offsets = [0, 192], sizes = [16, 32], strides = [1, 1]} : vector<16x384xf32> to vector<16x32xf32>
    %20 = vector.shape_cast %19 : vector<16x32xf32> to vector<1x16x32xf32>
    %21 = arith.truncf %20 : vector<1x16x32xf32> to vector<1x16x32xbf16>
    "tpu.trace_start"() <{level = 10 : i32, message = "bqd,bkd->bqk"}> : () -> ()
    %cst_6 = arith.constant dense<0.000000e+00> : vector<1x16x16xf32>
    %22 = tpu.matmul %15, %18, %cst_6 {dimension_numbers = #tpu.dot_dimension_numbers<[2], [2], [1], [1], [0, 0, 0, 1, 1, 1], [0], [0]>} : vector<1x16x32xbf16>, vector<1x16x32xbf16>, vector<1x16x16xf32> -> vector<1x16x16xf32>
    "tpu.trace_stop"() : () -> ()
    %cst_7 = arith.constant dense<0xFF800000> : vector<1x16xf32>
    %23 = vector.multi_reduction <maximumf>, %22, %cst_7 [2] : vector<1x16x16xf32> to vector<1x16xf32>
    %24 = vector.shape_cast %23 : vector<1x16xf32> to vector<1x16x1xf32>
    %25 = vector.broadcast %24 : vector<1x16x1xf32> to vector<1x16x16xf32>
    %26 = arith.subf %22, %25 : vector<1x16x16xf32>
    %27 = math.exp %26 : vector<1x16x16xf32>
    %cst_8 = arith.constant dense<0.000000e+00> : vector<1x16xf32>
    %28 = vector.multi_reduction <add>, %27, %cst_8 [2] : vector<1x16x16xf32> to vector<1x16xf32>
    %29 = vector.shape_cast %28 : vector<1x16xf32> to vector<1x16x1xf32>
    %30 = tpu.reciprocal %29 {approx = true} : vector<1x16x1xf32> -> vector<1x16x1xf32>
    %31 = vector.broadcast %30 : vector<1x16x1xf32> to vector<1x16x16xf32>
    %32 = arith.mulf %27, %31 : vector<1x16x16xf32>
    %33 = arith.truncf %32 : vector<1x16x16xf32> to vector<1x16x16xbf16>
    "tpu.trace_start"() <{level = 10 : i32, message = "bqk,bkd->bqd"}> : () -> ()
    %cst_9 = arith.constant dense<0.000000e+00> : vector<1x16x32xf32>
    %34 = tpu.matmul %33, %21, %cst_9 {dimension_numbers = #tpu.dot_dimension_numbers<[2], [1], [1], [2], [0, 0, 0, 1, 1, 2], [0], [0]>} : vector<1x16x16xbf16>, vector<1x16x32xbf16>, vector<1x16x32xf32> -> vector<1x16x32xf32>
    "tpu.trace_stop"() : () -> ()
    %35 = vector.shape_cast %34 : vector<1x16x32xf32> to vector<16x32xf32>
    %36 = arith.truncf %35 : vector<16x32xf32> to vector<16x32xbf16>
    %37 = vector.extract_strided_slice %12 {offsets = [0, 32], sizes = [16, 32], strides = [1, 1]} : vector<16x384xf32> to vector<16x32xf32>
    %38 = vector.shape_cast %37 : vector<16x32xf32> to vector<1x16x32xf32>
    %39 = arith.truncf %38 : vector<1x16x32xf32> to vector<1x16x32xbf16>
    %40 = vector.extract_strided_slice %12 {offsets = [0, 128], sizes = [16, 32], strides = [1, 1]} : vector<16x384xf32> to vector<16x32xf32>
    %41 = vector.shape_cast %40 : vector<16x32xf32> to vector<1x16x32xf32>
    %42 = arith.truncf %41 : vector<1x16x32xf32> to vector<1x16x32xbf16>
    %43 = vector.extract_strided_slice %12 {offsets = [0, 224], sizes = [16, 32], strides = [1, 1]} : vector<16x384xf32> to vector<16x32xf32>
    %44 = vector.shape_cast %43 : vector<16x32xf32> to vector<1x16x32xf32>
    %45 = arith.truncf %44 : vector<1x16x32xf32> to vector<1x16x32xbf16>
    "tpu.trace_start"() <{level = 10 : i32, message = "bqd,bkd->bqk"}> : () -> ()
    %cst_10 = arith.constant dense<0.000000e+00> : vector<1x16x16xf32>
    %46 = tpu.matmul %39, %42, %cst_10 {dimension_numbers = #tpu.dot_dimension_numbers<[2], [2], [1], [1], [0, 0, 0, 1, 1, 1], [0], [0]>} : vector<1x16x32xbf16>, vector<1x16x32xbf16>, vector<1x16x16xf32> -> vector<1x16x16xf32>
    "tpu.trace_stop"() : () -> ()
    %cst_11 = arith.constant dense<0xFF800000> : vector<1x16xf32>
    %47 = vector.multi_reduction <maximumf>, %46, %cst_11 [2] : vector<1x16x16xf32> to vector<1x16xf32>
    %48 = vector.shape_cast %47 : vector<1x16xf32> to vector<1x16x1xf32>
    %49 = vector.broadcast %48 : vector<1x16x1xf32> to vector<1x16x16xf32>
    %50 = arith.subf %46, %49 : vector<1x16x16xf32>
    %51 = math.exp %50 : vector<1x16x16xf32>
    %cst_12 = arith.constant dense<0.000000e+00> : vector<1x16xf32>
    %52 = vector.multi_reduction <add>, %51, %cst_12 [2] : vector<1x16x16xf32> to vector<1x16xf32>
    %53 = vector.shape_cast %52 : vector<1x16xf32> to vector<1x16x1xf32>
    %54 = tpu.reciprocal %53 {approx = true} : vector<1x16x1xf32> -> vector<1x16x1xf32>
    %55 = vector.broadcast %54 : vector<1x16x1xf32> to vector<1x16x16xf32>
    %56 = arith.mulf %51, %55 : vector<1x16x16xf32>
    %57 = arith.truncf %56 : vector<1x16x16xf32> to vector<1x16x16xbf16>
    "tpu.trace_start"() <{level = 10 : i32, message = "bqk,bkd->bqd"}> : () -> ()
    %cst_13 = arith.constant dense<0.000000e+00> : vector<1x16x32xf32>
    %58 = tpu.matmul %57, %45, %cst_13 {dimension_numbers = #tpu.dot_dimension_numbers<[2], [1], [1], [2], [0, 0, 0, 1, 1, 2], [0], [0]>} : vector<1x16x16xbf16>, vector<1x16x32xbf16>, vector<1x16x32xf32> -> vector<1x16x32xf32>
    "tpu.trace_stop"() : () -> ()
    %59 = vector.shape_cast %58 : vector<1x16x32xf32> to vector<16x32xf32>
    %60 = arith.truncf %59 : vector<16x32xf32> to vector<16x32xbf16>
    %61 = vector.extract_strided_slice %12 {offsets = [0, 64], sizes = [16, 32], strides = [1, 1]} : vector<16x384xf32> to vector<16x32xf32>
    %62 = vector.shape_cast %61 : vector<16x32xf32> to vector<1x16x32xf32>
    %63 = arith.truncf %62 : vector<1x16x32xf32> to vector<1x16x32xbf16>
    %64 = vector.extract_strided_slice %12 {offsets = [0, 160], sizes = [16, 32], strides = [1, 1]} : vector<16x384xf32> to vector<16x32xf32>
    %65 = vector.shape_cast %64 : vector<16x32xf32> to vector<1x16x32xf32>
    %66 = arith.truncf %65 : vector<1x16x32xf32> to vector<1x16x32xbf16>
    %67 = vector.extract_strided_slice %12 {offsets = [0, 256], sizes = [16, 32], strides = [1, 1]} : vector<16x384xf32> to vector<16x32xf32>
    %68 = vector.shape_cast %67 : vector<16x32xf32> to vector<1x16x32xf32>
    %69 = arith.truncf %68 : vector<1x16x32xf32> to vector<1x16x32xbf16>
    "tpu.trace_start"() <{level = 10 : i32, message = "bqd,bkd->bqk"}> : () -> ()
    %cst_14 = arith.constant dense<0.000000e+00> : vector<1x16x16xf32>
    %70 = tpu.matmul %63, %66, %cst_14 {dimension_numbers = #tpu.dot_dimension_numbers<[2], [2], [1], [1], [0, 0, 0, 1, 1, 1], [0], [0]>} : vector<1x16x32xbf16>, vector<1x16x32xbf16>, vector<1x16x16xf32> -> vector<1x16x16xf32>
    "tpu.trace_stop"() : () -> ()
    %cst_15 = arith.constant dense<0xFF800000> : vector<1x16xf32>
    %71 = vector.multi_reduction <maximumf>, %70, %cst_15 [2] : vector<1x16x16xf32> to vector<1x16xf32>
    %72 = vector.shape_cast %71 : vector<1x16xf32> to vector<1x16x1xf32>
    %73 = vector.broadcast %72 : vector<1x16x1xf32> to vector<1x16x16xf32>
    %74 = arith.subf %70, %73 : vector<1x16x16xf32>
    %75 = math.exp %74 : vector<1x16x16xf32>
    %cst_16 = arith.constant dense<0.000000e+00> : vector<1x16xf32>
    %76 = vector.multi_reduction <add>, %75, %cst_16 [2] : vector<1x16x16xf32> to vector<1x16xf32>
    %77 = vector.shape_cast %76 : vector<1x16xf32> to vector<1x16x1xf32>
    %78 = tpu.reciprocal %77 {approx = true} : vector<1x16x1xf32> -> vector<1x16x1xf32>
    %79 = vector.broadcast %78 : vector<1x16x1xf32> to vector<1x16x16xf32>
    %80 = arith.mulf %75, %79 : vector<1x16x16xf32>
    %81 = arith.truncf %80 : vector<1x16x16xf32> to vector<1x16x16xbf16>
    "tpu.trace_start"() <{level = 10 : i32, message = "bqk,bkd->bqd"}> : () -> ()
    %cst_17 = arith.constant dense<0.000000e+00> : vector<1x16x32xf32>
    %82 = tpu.matmul %81, %69, %cst_17 {dimension_numbers = #tpu.dot_dimension_numbers<[2], [1], [1], [2], [0, 0, 0, 1, 1, 2], [0], [0]>} : vector<1x16x16xbf16>, vector<1x16x32xbf16>, vector<1x16x32xf32> -> vector<1x16x32xf32>
    "tpu.trace_stop"() : () -> ()
    %83 = vector.shape_cast %82 : vector<1x16x32xf32> to vector<16x32xf32>
    %84 = arith.truncf %83 : vector<16x32xf32> to vector<16x32xbf16>
    %85 = tpu.concatenate %36, %60, %84 in 1 : vector<16x32xbf16>, vector<16x32xbf16>, vector<16x32xbf16> -> vector<16x96xbf16>
    %c0_18 = arith.constant 0 : index
    %c0_19 = arith.constant 0 : index
    %86 = vector.load %arg4[%c0_18, %c0_19] : memref<96x128xbf16, #tpu.memory_space<vmem>>, vector<96x128xbf16>
    %cst_20 = arith.constant dense<0.000000e+00> : vector<16x128xf32>
    %87 = tpu.matmul %85, %86, %cst_20 {dimension_numbers = #tpu.dot_dimension_numbers<[1], [0], [0], [1], [0, 0, 1, 1], [], []>} : vector<16x96xbf16>, vector<96x128xbf16>, vector<16x128xf32> -> vector<16x128xf32>
    %c0_21 = arith.constant 0 : index
    %c0_22 = arith.constant 0 : index
    %88 = vector.load %arg5[%c0_21, %c0_22] : memref<1x128xf32, #tpu.memory_space<vmem>>, vector<1x128xf32>
    %89 = vector.broadcast %88 : vector<1x128xf32> to vector<16x128xf32>
    %90 = arith.addf %87, %89 : vector<16x128xf32>
    %91 = arith.addf %1, %90 : vector<16x128xf32>
    %c0_23 = arith.constant 0 : index
    %c0_24 = arith.constant 0 : index
    %92 = vector.load %arg6[%c0_23, %c0_24] : memref<1x128xf32, #tpu.memory_space<vmem>>, vector<1x128xf32>
    %c0_25 = arith.constant 0 : index
    %c0_26 = arith.constant 0 : index
    %93 = vector.load %arg7[%c0_25, %c0_26] : memref<1x128xf32, #tpu.memory_space<vmem>>, vector<1x128xf32>
    %cst_27 = arith.constant dense<0.000000e+00> : vector<16xf32>
    %94 = vector.multi_reduction <add>, %91, %cst_27 [1] : vector<16x128xf32> to vector<16xf32>
    %95 = vector.shape_cast %94 : vector<16xf32> to vector<16x1xf32>
    %cst_28 = arith.constant 0.010416667 : f32
    %96 = vector.broadcast %cst_28 : f32 to vector<16x1xf32>
    %97 = arith.mulf %95, %96 : vector<16x1xf32>
    %98 = vector.broadcast %97 : vector<16x1xf32> to vector<16x128xf32>
    %99 = arith.subf %91, %98 : vector<16x128xf32>
    %100 = vector.broadcast %7 : vector<1x128xf32> to vector<16x128xf32>
    %101 = arith.mulf %99, %100 : vector<16x128xf32>
    %102 = arith.mulf %101, %101 : vector<16x128xf32>
    %cst_29 = arith.constant dense<0.000000e+00> : vector<16xf32>
    %103 = vector.multi_reduction <add>, %102, %cst_29 [1] : vector<16x128xf32> to vector<16xf32>
    %104 = vector.shape_cast %103 : vector<16xf32> to vector<16x1xf32>
    %cst_30 = arith.constant 0.010416667 : f32
    %105 = vector.broadcast %cst_30 : f32 to vector<16x1xf32>
    %106 = arith.mulf %104, %105 : vector<16x1xf32>
    %cst_31 = arith.constant 9.99999974E-6 : f32
    %107 = vector.broadcast %cst_31 : f32 to vector<16x1xf32>
    %108 = arith.addf %106, %107 : vector<16x1xf32>
    %109 = math.rsqrt %108 : vector<16x1xf32>
    %110 = vector.broadcast %109 : vector<16x1xf32> to vector<16x128xf32>
    %111 = arith.mulf %101, %110 : vector<16x128xf32>
    %112 = vector.broadcast %92 : vector<1x128xf32> to vector<16x128xf32>
    %113 = arith.mulf %111, %112 : vector<16x128xf32>
    %114 = vector.broadcast %93 : vector<1x128xf32> to vector<16x128xf32>
    %115 = arith.addf %113, %114 : vector<16x128xf32>
    %116 = arith.truncf %115 : vector<16x128xf32> to vector<16x128xbf16>
    %cst_32 = arith.constant 0.000000e+00 : f32
    %117 = vector.broadcast %cst_32 : f32 to vector<16x128xf32>
    %c0_33 = arith.constant 0 : index
    %c0_34 = arith.constant 0 : index
    %118 = vector.load %arg8[%c0_33, %c0_34] : memref<128x2048xbf16, #tpu.memory_space<vmem>>, vector<128x512xbf16>
    %cst_35 = arith.constant dense<0.000000e+00> : vector<16x512xf32>
    %119 = tpu.matmul %116, %118, %cst_35 {dimension_numbers = #tpu.dot_dimension_numbers<[1], [0], [0], [1], [0, 0, 1, 1], [], []>} : vector<16x128xbf16>, vector<128x512xbf16>, vector<16x512xf32> -> vector<16x512xf32>
    %c0_36 = arith.constant 0 : index
    %c0_37 = arith.constant 0 : index
    %120 = vector.load %arg9[%c0_36, %c0_37] : memref<1x2048xf32, #tpu.memory_space<vmem>>, vector<1x512xf32>
    %121 = vector.broadcast %120 : vector<1x512xf32> to vector<16x512xf32>
    %122 = arith.addf %119, %121 : vector<16x512xf32>
    %cst_38 = arith.constant 0.000000e+00 : f32
    %123 = vector.broadcast %cst_38 : f32 to vector<16x512xf32>
    %124 = arith.maximumf %122, %123 : vector<16x512xf32>
    %125 = arith.truncf %124 : vector<16x512xf32> to vector<16x512xbf16>
    %c0_39 = arith.constant 0 : index
    %c0_40 = arith.constant 0 : index
    %126 = vector.load %arg10[%c0_39, %c0_40] : memref<2048x128xbf16, #tpu.memory_space<vmem>>, vector<512x128xbf16>
    %cst_41 = arith.constant dense<0.000000e+00> : vector<16x128xf32>
    %127 = tpu.matmul %125, %126, %cst_41 {dimension_numbers = #tpu.dot_dimension_numbers<[1], [0], [0], [1], [0, 0, 1, 1], [], []>} : vector<16x512xbf16>, vector<512x128xbf16>, vector<16x128xf32> -> vector<16x128xf32>
    %128 = arith.addf %117, %127 : vector<16x128xf32>
    %c0_42 = arith.constant 0 : index
    %c512 = arith.constant 512 : index
    %129 = vector.load %arg8[%c0_42, %c512] : memref<128x2048xbf16, #tpu.memory_space<vmem>>, vector<128x512xbf16>
    %cst_43 = arith.constant dense<0.000000e+00> : vector<16x512xf32>
    %130 = tpu.matmul %116, %129, %cst_43 {dimension_numbers = #tpu.dot_dimension_numbers<[1], [0], [0], [1], [0, 0, 1, 1], [], []>} : vector<16x128xbf16>, vector<128x512xbf16>, vector<16x512xf32> -> vector<16x512xf32>
    %c0_44 = arith.constant 0 : index
    %c512_45 = arith.constant 512 : index
    %131 = vector.load %arg9[%c0_44, %c512_45] : memref<1x2048xf32, #tpu.memory_space<vmem>>, vector<1x512xf32>
    %132 = vector.broadcast %131 : vector<1x512xf32> to vector<16x512xf32>
    %133 = arith.addf %130, %132 : vector<16x512xf32>
    %cst_46 = arith.constant 0.000000e+00 : f32
    %134 = vector.broadcast %cst_46 : f32 to vector<16x512xf32>
    %135 = arith.maximumf %133, %134 : vector<16x512xf32>
    %136 = arith.truncf %135 : vector<16x512xf32> to vector<16x512xbf16>
    %c512_47 = arith.constant 512 : index
    %c0_48 = arith.constant 0 : index
    %137 = vector.load %arg10[%c512_47, %c0_48] : memref<2048x128xbf16, #tpu.memory_space<vmem>>, vector<512x128xbf16>
    %cst_49 = arith.constant dense<0.000000e+00> : vector<16x128xf32>
    %138 = tpu.matmul %136, %137, %cst_49 {dimension_numbers = #tpu.dot_dimension_numbers<[1], [0], [0], [1], [0, 0, 1, 1], [], []>} : vector<16x512xbf16>, vector<512x128xbf16>, vector<16x128xf32> -> vector<16x128xf32>
    %139 = arith.addf %128, %138 : vector<16x128xf32>
    %c0_50 = arith.constant 0 : index
    %c1024 = arith.constant 1024 : index
    %140 = vector.load %arg8[%c0_50, %c1024] : memref<128x2048xbf16, #tpu.memory_space<vmem>>, vector<128x512xbf16>
    %cst_51 = arith.constant dense<0.000000e+00> : vector<16x512xf32>
    %141 = tpu.matmul %116, %140, %cst_51 {dimension_numbers = #tpu.dot_dimension_numbers<[1], [0], [0], [1], [0, 0, 1, 1], [], []>} : vector<16x128xbf16>, vector<128x512xbf16>, vector<16x512xf32> -> vector<16x512xf32>
    %c0_52 = arith.constant 0 : index
    %c1024_53 = arith.constant 1024 : index
    %142 = vector.load %arg9[%c0_52, %c1024_53] : memref<1x2048xf32, #tpu.memory_space<vmem>>, vector<1x512xf32>
    %143 = vector.broadcast %142 : vector<1x512xf32> to vector<16x512xf32>
    %144 = arith.addf %141, %143 : vector<16x512xf32>
    %cst_54 = arith.constant 0.000000e+00 : f32
    %145 = vector.broadcast %cst_54 : f32 to vector<16x512xf32>
    %146 = arith.maximumf %144, %145 : vector<16x512xf32>
    %147 = arith.truncf %146 : vector<16x512xf32> to vector<16x512xbf16>
    %c1024_55 = arith.constant 1024 : index
    %c0_56 = arith.constant 0 : index
    %148 = vector.load %arg10[%c1024_55, %c0_56] : memref<2048x128xbf16, #tpu.memory_space<vmem>>, vector<512x128xbf16>
    %cst_57 = arith.constant dense<0.000000e+00> : vector<16x128xf32>
    %149 = tpu.matmul %147, %148, %cst_57 {dimension_numbers = #tpu.dot_dimension_numbers<[1], [0], [0], [1], [0, 0, 1, 1], [], []>} : vector<16x512xbf16>, vector<512x128xbf16>, vector<16x128xf32> -> vector<16x128xf32>
    %150 = arith.addf %139, %149 : vector<16x128xf32>
    %c0_58 = arith.constant 0 : index
    %c1536 = arith.constant 1536 : index
    %151 = vector.load %arg8[%c0_58, %c1536] : memref<128x2048xbf16, #tpu.memory_space<vmem>>, vector<128x512xbf16>
    %cst_59 = arith.constant dense<0.000000e+00> : vector<16x512xf32>
    %152 = tpu.matmul %116, %151, %cst_59 {dimension_numbers = #tpu.dot_dimension_numbers<[1], [0], [0], [1], [0, 0, 1, 1], [], []>} : vector<16x128xbf16>, vector<128x512xbf16>, vector<16x512xf32> -> vector<16x512xf32>
    %c0_60 = arith.constant 0 : index
    %c1536_61 = arith.constant 1536 : index
    %153 = vector.load %arg9[%c0_60, %c1536_61] : memref<1x2048xf32, #tpu.memory_space<vmem>>, vector<1x512xf32>
    %154 = vector.broadcast %153 : vector<1x512xf32> to vector<16x512xf32>
    %155 = arith.addf %152, %154 : vector<16x512xf32>
    %cst_62 = arith.constant 0.000000e+00 : f32
    %156 = vector.broadcast %cst_62 : f32 to vector<16x512xf32>
    %157 = arith.maximumf %155, %156 : vector<16x512xf32>
    %158 = arith.truncf %157 : vector<16x512xf32> to vector<16x512xbf16>
    %c1536_63 = arith.constant 1536 : index
    %c0_64 = arith.constant 0 : index
    %159 = vector.load %arg10[%c1536_63, %c0_64] : memref<2048x128xbf16, #tpu.memory_space<vmem>>, vector<512x128xbf16>
    %cst_65 = arith.constant dense<0.000000e+00> : vector<16x128xf32>
    %160 = tpu.matmul %158, %159, %cst_65 {dimension_numbers = #tpu.dot_dimension_numbers<[1], [0], [0], [1], [0, 0, 1, 1], [], []>} : vector<16x512xbf16>, vector<512x128xbf16>, vector<16x128xf32> -> vector<16x128xf32>
    %161 = arith.addf %150, %160 : vector<16x128xf32>
    %c0_66 = arith.constant 0 : index
    %c0_67 = arith.constant 0 : index
    %162 = vector.load %arg11[%c0_66, %c0_67] : memref<1x128xf32, #tpu.memory_space<vmem>>, vector<1x128xf32>
    %163 = vector.broadcast %162 : vector<1x128xf32> to vector<16x128xf32>
    %164 = arith.addf %161, %163 : vector<16x128xf32>
    %165 = arith.addf %115, %164 : vector<16x128xf32>
    %c0_68 = arith.constant 0 : index
    %c0_69 = arith.constant 0 : index
    %166 = vector.load %arg12[%c0_68, %c0_69] : memref<1x128xf32, #tpu.memory_space<vmem>>, vector<1x128xf32>
    %c0_70 = arith.constant 0 : index
    %c0_71 = arith.constant 0 : index
    %167 = vector.load %arg13[%c0_70, %c0_71] : memref<1x128xf32, #tpu.memory_space<vmem>>, vector<1x128xf32>
    %cst_72 = arith.constant dense<0.000000e+00> : vector<16xf32>
    %168 = vector.multi_reduction <add>, %165, %cst_72 [1] : vector<16x128xf32> to vector<16xf32>
    %169 = vector.shape_cast %168 : vector<16xf32> to vector<16x1xf32>
    %cst_73 = arith.constant 0.010416667 : f32
    %170 = vector.broadcast %cst_73 : f32 to vector<16x1xf32>
    %171 = arith.mulf %169, %170 : vector<16x1xf32>
    %172 = vector.broadcast %171 : vector<16x1xf32> to vector<16x128xf32>
    %173 = arith.subf %165, %172 : vector<16x128xf32>
    %174 = vector.broadcast %7 : vector<1x128xf32> to vector<16x128xf32>
    %175 = arith.mulf %173, %174 : vector<16x128xf32>
    %176 = arith.mulf %175, %175 : vector<16x128xf32>
    %cst_74 = arith.constant dense<0.000000e+00> : vector<16xf32>
    %177 = vector.multi_reduction <add>, %176, %cst_74 [1] : vector<16x128xf32> to vector<16xf32>
    %178 = vector.shape_cast %177 : vector<16xf32> to vector<16x1xf32>
    %cst_75 = arith.constant 0.010416667 : f32
    %179 = vector.broadcast %cst_75 : f32 to vector<16x1xf32>
    %180 = arith.mulf %178, %179 : vector<16x1xf32>
    %cst_76 = arith.constant 9.99999974E-6 : f32
    %181 = vector.broadcast %cst_76 : f32 to vector<16x1xf32>
    %182 = arith.addf %180, %181 : vector<16x1xf32>
    %183 = math.rsqrt %182 : vector<16x1xf32>
    %184 = vector.broadcast %183 : vector<16x1xf32> to vector<16x128xf32>
    %185 = arith.mulf %175, %184 : vector<16x128xf32>
    %186 = vector.broadcast %166 : vector<1x128xf32> to vector<16x128xf32>
    %187 = arith.mulf %185, %186 : vector<16x128xf32>
    %188 = vector.broadcast %167 : vector<1x128xf32> to vector<16x128xf32>
    %189 = arith.addf %187, %188 : vector<16x128xf32>
    %190 = vector.shape_cast %189 : vector<16x128xf32> to vector<1x16x128xf32>
    %c0_77 = arith.constant 0 : index
    %c0_78 = arith.constant 0 : index
    %c0_79 = arith.constant 0 : index
    %191 = vector.load %arg16[%c0_77, %c0_78, %c0_79] : memref<1x16x128xf32, #tpu.memory_space<vmem>>, vector<1x16x128xf32>
    tpu.vector_store %arg16[%c0_77, %c0_78, %c0_79], %190 {strides = array<i32>} : memref<1x16x128xf32, #tpu.memory_space<vmem>>, vector<1x16x128xf32>,
    return
  }
  func.func @transform_0(%arg0: i32) -> (i32, i32, i32) {
    %c0_i32 = arith.constant 0 : i32
    %c0_i32_0 = arith.constant 0 : i32
    %c0_i32_1 = arith.constant 0 : i32
    return %arg0, %c0_i32, %c0_i32_0 : i32, i32, i32
  }
  func.func @transform_1(%arg0: i32) -> (i32, i32) {
    %c0_i32 = arith.constant 0 : i32
    %c0_i32_0 = arith.constant 0 : i32
    %c0_i32_1 = arith.constant 0 : i32
    return %c0_i32, %c0_i32_0 : i32, i32
  }
  func.func @transform_2(%arg0: i32) -> (i32, i32) {
    %c0_i32 = arith.constant 0 : i32
    %c0_i32_0 = arith.constant 0 : i32
    %c0_i32_1 = arith.constant 0 : i32
    return %c0_i32, %c0_i32_0 : i32, i32
  }
  func.func @transform_3(%arg0: i32) -> (i32, i32) {
    %c0_i32 = arith.constant 0 : i32
    %c0_i32_0 = arith.constant 0 : i32
    %c0_i32_1 = arith.constant 0 : i32
    return %c0_i32, %c0_i32_0 : i32, i32
  }
  func.func @transform_4(%arg0: i32) -> (i32, i32) {
    %c0_i32 = arith.constant 0 : i32
    %c0_i32_0 = arith.constant 0 : i32
    %c0_i32_1 = arith.constant 0 : i32
    return %c0_i32, %c0_i32_0 : i32, i32
  }
  func.func @transform_5(%arg0: i32) -> (i32, i32) {
    %c0_i32 = arith.constant 0 : i32
    %c0_i32_0 = arith.constant 0 : i32
    %c0_i32_1 = arith.constant 0 : i32
    return %c0_i32, %c0_i32_0 : i32, i32
  }
  func.func @transform_6(%arg0: i32) -> (i32, i32) {
    %c0_i32 = arith.constant 0 : i32
    %c0_i32_0 = arith.constant 0 : i32
    %c0_i32_1 = arith.constant 0 : i32
    return %c0_i32, %c0_i32_0 : i32, i32
  }
  func.func @transform_7(%arg0: i32) -> (i32, i32) {
    %c0_i32 = arith.constant 0 : i32
    %c0_i32_0 = arith.constant 0 : i32
    %c0_i32_1 = arith.constant 0 : i32
    return %c0_i32, %c0_i32_0 : i32, i32
  }
  func.func @transform_8(%arg0: i32) -> (i32, i32) {
    %c0_i32 = arith.constant 0 : i32
    %c0_i32_0 = arith.constant 0 : i32
    %c0_i32_1 = arith.constant 0 : i32
    return %c0_i32, %c0_i32_0 : i32, i32
  }
  func.func @transform_9(%arg0: i32) -> (i32, i32) {
    %c0_i32 = arith.constant 0 : i32
    %c0_i32_0 = arith.constant 0 : i32
    %c0_i32_1 = arith.constant 0 : i32
    return %c0_i32, %c0_i32_0 : i32, i32
  }
  func.func @transform_10(%arg0: i32) -> (i32, i32) {
    %c0_i32 = arith.constant 0 : i32
    %c0_i32_0 = arith.constant 0 : i32
    %c0_i32_1 = arith.constant 0 : i32
    return %c0_i32, %c0_i32_0 : i32, i32
  }
  func.func @transform_11(%arg0: i32) -> (i32, i32) {
    %c0_i32 = arith.constant 0 : i32
    %c0_i32_0 = arith.constant 0 : i32
    %c0_i32_1 = arith.constant 0 : i32
    return %c0_i32, %c0_i32_0 : i32, i32
  }
  func.func @transform_12(%arg0: i32) -> (i32, i32) {
    %c0_i32 = arith.constant 0 : i32
    %c0_i32_0 = arith.constant 0 : i32
    %c0_i32_1 = arith.constant 0 : i32
    return %c0_i32, %c0_i32_0 : i32, i32
  }
  func.func @transform_13(%arg0: i32) -> (i32, i32) {
    %c0_i32 = arith.constant 0 : i32
    %c0_i32_0 = arith.constant 0 : i32
    %c0_i32_1 = arith.constant 0 : i32
    return %c0_i32, %c0_i32_0 : i32, i32
  }
  func.func @transform_14(%arg0: i32) -> (i32, i32) {
    %c0_i32 = arith.constant 0 : i32
    %c0_i32_0 = arith.constant 0 : i32
    %c0_i32_1 = arith.constant 0 : i32
    return %c0_i32, %c0_i32_0 : i32, i32
  }
  func.func @transform_15(%arg0: i32) -> (i32, i32, i32) {
    %c0_i32 = arith.constant 0 : i32
    %c0_i32_0 = arith.constant 0 : i32
    %c0_i32_1 = arith.constant 0 : i32
    return %arg0, %c0_i32, %c0_i32_0 : i32, i32, i32
  }
}

</mosaic_0001>

<bundles_post_ra>
// kernel: tpu_custom_call.1
= control target key start
LH: loop header
LB: loop body
LE: loop exit
PB: predicated region body
PF: predicated region fallthrough
CT: control target
= control target key end

     0   :  { %s5886_s0 = inlined_call_operand.hbm [shape: f32[2,16,128], index: 0, kind: input, shape index: {}]   ;;  %s5887_s1 = inlined_call_operand.hbm [shape: bf16[128,384], index: 1, kind: input, shape index: {}]   ;;  %s5888_s2 = inlined_call_operand.vmem [shape: f32[1,384], index: 2, kind: input, shape index: {}]   ;;  %s5889_s3 = inlined_call_operand.hbm [shape: bf16[96,128], index: 3, kind: input, shape index: {}]   ;;  %s5890_s4 = inlined_call_operand.vmem [shape: f32[1,128], index: 4, kind: input, shape index: {}]   ;;  %s5891_s5 = inlined_call_operand.vmem [shape: f32[1,128], index: 5, kind: input, shape index: {}]   ;;  %s5892_s6 = inlined_call_operand.vmem [shape: f32[1,128], index: 6, kind: input, shape index: {}]   ;;  %s5893_s7 = inlined_call_operand.hbm [shape: bf16[128,2048], index: 7, kind: input, shape index: {}]   ;;  %s5894_s8 = inlined_call_operand.vmem [shape: f32[1,2048], index: 8, kind: input, shape index: {}]   ;;  %s5895_s9 = inlined_call_operand.hbm [shape: bf16[2048,128], index: 9, kind: input, shape index: {}]   ;;  %s5896_s10 = inlined_call_operand.vmem [shape: f32[1,128], index: 10, kind: input, shape index: {}]   ;;  %s5897_s11 = inlined_call_operand.vmem [shape: f32[1,128], index: 11, kind: input, shape index: {}]   ;;  %s5898_s12 = inlined_call_operand.vmem [shape: f32[1,128], index: 12, kind: input, shape index: {}]   ;;  %s5899_s13 = inlined_call_operand.vmem [shape: f32[1,128], index: 13, kind: input, shape index: {}]   ;;  %s5900_s14 = inlined_call_operand.vmem [shape: f32[1,128], index: 14, kind: input, shape index: {}]   ;;  %s5901_s15 = inlined_call_operand.hbm [shape: f32[2,16,128], index: 15, kind: output, shape index: {}]  }
   0x1   :  { %5909 = sst [smem:[#allocation18_spill]] %s5887_s1 }
   0x2   :  { %5910 = sst [smem:[#allocation19_spill]] %s5892_s6 }
   0x3   :  { %5911 = sst [smem:[#allocation20_spill]] %s5894_s8 }
   0x4   :  { %5912 = sst [smem:[#allocation21_spill]] %s5896_s10 }
   0x5   :  { %5913 = sst [smem:[#allocation22_spill]] %s5897_s11 }
   0x6   :  { %5914 = sst [smem:[#allocation23_spill]] %s5898_s12 }
   0x7   :  { %5915 = sst [smem:[#allocation24_spill]] %s5901_s15 }
   0x8   :  { %20 = vsyncpa [#allocation3], 0 }
   0x9   :  { %22 = vsyncpa [#allocation3 + $0x1], 0 }
   0xa   :  { %23 = vsyncpa [#allocation6], 0 }
   0xb   :  { %24 = vsyncpa [#allocation9], 0 }
   0xc   :  { %25 = vsyncpa [#allocation4], 0 }
   0xd   :  { %27 = vsyncpa [#allocation4 + $0x1], 0  ;;  %s5366_s18 = smov 0   ;;  %s5368_s19 = smov 0  }
   0xe   :  { %s5370_s20 = smov 0   ;;  %s5372_s21 = smov 0  }
   0xf LB: > { %5916 = sst [smem:[#allocation16_spill]] %s5251_s18  ;;  %s5387_s13 = sadd.s32 4294967295, %s5263_s21   ;;  %s5263_s21 = sphi %s5372_s21, %s5946_s21   ;;  %s5259_s20 = sphi %s5370_s20, %s5945_s20   ;;  %s5255_s19 = sphi %s5368_s19, %s5944_s19   ;;  %s5251_s18 = sphi %s5366_s18, %s5943_s18  }
  0x10   : > { %s4147_s14 = sadd.s32 4294967294, %s5263_s21   ;;  %p53_p0 = scmp.ne.s32.totalorder %s5255_s19, %s5251_s18 }
  0x11   : > { %p5904_p1 = scmp.eq.s32.totalorder %s5387_s13, 0  ;;  %p377_p3 = scmp.eq.s32.totalorder %s4147_s14, 1 }
  0x12   : > { %p4148_p5 = scmp.ge.s32.totalorder %s5263_s21, 1  ;;  %p384_p7 = scmp.lt.s32.totalorder %s5263_s21, 3 }
  0x13   : > { %p5396_p4 = por %p5904_p1, %p53_p0  ;;  %p5401_p6 = por %p377_p3, %p53_p0 }
  0x14   : > { %p5406_p8 = pnand %p4148_p5, %p384_p7  ;;  %s5265_s25 = smov [#allocation5]  }
  0x15   : > { %s5917_s22 = scalar_select %p5396_p4, 1, 0 }
  0x16   : > { %s5918_s23 = scalar_select %p5401_p6, 1, 0 }
  0x17   : > { %s5920_s24 = scalar_select %p5406_p8, 1, 0 }
  0x18   : > { %5919 = sst [smem:[#allocation17_spill]] %s5918_s23  ;;  %s396_s26 = sshll.u32 %s5265_s25, 4  ;;  %s5410_s26 = int_to_ptr.vmem [resolvable:$true] %s396_s26 }
  0x19   : > { %p4767_p9 = pneg %p5406_p8  ;;  %s5266_s28 = smov [#allocation8]  }
  0x1a   : > { %s434_s29 = sshll.u32 %s5266_s28, 4  ;;  %s5922_s1 = sld [smem:[#allocation18_spill]]  ;;  %s5421_s29 = int_to_ptr.vmem [resolvable:$true] %s434_s29 }
  0x1b   : > { %p5417_p11 = pnand %p4767_p9, %p5904_p1 }
  0x1d   : > { %p5431_p13 = pneg %p5417_p11 }
  0x20   : > { %s5047_s17 = scalar_lea.hbm %s5922_s1, 3072 }
  0x21   : > { %p5048_p12 = scmp.ne.s32.totalorder %s5922_s1, %s5047_s17  ;;  %p5054_p5 = scmp.lt.u32.totalorder %s5047_s17, %s5922_s1 }
  0x23   : > { %p5050_p0 = pnand %p5431_p13, %p5048_p12 }
  0x25   : > { %p5051_p3 = pneg %p5050_p0 }
  0x27   : > { %p5056_p7 = pnand %p5054_p5, %p5051_p3 }
  0x29   : > { %5059 = shalt.err (!%p5056_p7)
}
  0x2a   : > { %s5060_s30 = scalar_lea.vmem %s5410_s26, 3072  ;;  %p5068_p2 = scmp.lt.s32.totalorder %s5410_s26, %s5410_s26 }
  0x2b   : > { %p5061_p9 = scmp.ne.s32.totalorder %s5410_s26, %s5060_s30  ;;  %p5069_p6 = scmp.lt.s32.totalorder %s5060_s30, %s5060_s30 }
  0x2d   : > { %p5063_p10 = pnand %p5061_p9, %p5431_p13  ;;  %p5070_p12 = por %p5069_p6, %p5068_p2 }
  0x2f   : > { %p5064_p1 = pneg %p5063_p10 }
  0x31   : > { %p5071_p0 = pnand %p5070_p12, %p5064_p1 }
  0x33   : > { %5074 = shalt.err (!%p5071_p0)
}
  0x34   : > { %s5267_s16 = smov 192   ;;  %s5268_s18 = smov 12  }
  0x35   : > { %4770 = dma.hbm_to_vmem [thread:$0]  (!%p5417_p11), %s5922_s1, 3072, %s5410_s26, [#allocation6], %s5267_s16, %s5267_s16, %s5268_s18  }
  0x36   : > { %s5075_s15 = scalar_lea.hbm %s5893_s7, 16384 }
  0x37   : > { %p5076_p2 = scmp.ne.s32.totalorder %s5893_s7, %s5075_s15  ;;  %p5082_p10 = scmp.lt.u32.totalorder %s5075_s15, %s5893_s7 }
  0x39   : > { %p5078_p1 = pnand %p5076_p2, %p5431_p13 }
  0x3b   : > { %p5079_p6 = pneg %p5078_p1 }
  0x3d   : > { %p5084_p3 = pnand %p5082_p10, %p5079_p6 }
  0x3f   : > { %5087 = shalt.err (!%p5084_p3)
}
  0x40   : > { %s5088_s26 = scalar_lea.vmem %s5421_s29, 16384  ;;  %p5096_p12 = scmp.lt.s32.totalorder %s5421_s29, %s5421_s29 }
  0x41   : > { %p5089_p5 = scmp.ne.s32.totalorder %s5421_s29, %s5088_s26  ;;  %p5097_p0 = scmp.lt.s32.totalorder %s5088_s26, %s5088_s26 }
  0x43   : > { %p5091_p7 = pnand %p5089_p5, %p5431_p13  ;;  %p5098_p2 = por %p5097_p0, %p5096_p12 }
  0x45   : > { %p5092_p9 = pneg %p5091_p7 }
  0x47   : > { %p5099_p1 = pnand %p5098_p2, %p5092_p9 }
  0x49   : > { %5102 = shalt.err (!%p5099_p1)
}
  0x4a   : > { %s5269_s11 = smov 1024   ;;  %s5270_s10 = smov 64  }
  0x4b   : > { %4776 = dma.hbm_to_vmem [thread:$0]  (!%p5417_p11), %s5893_s7, 16384, %s5421_s29, [#allocation9], %s5269_s11, %s5269_s11, %s5270_s10  }
  0x4c   : > { %s5271_s16 = smov [#allocation7]   ;;  %s5272_s17 = smov [#allocation10]  }
  0x4d   : > { %s412_s18 = sshll.u32 %s5271_s16, 4  ;;  %s450_s14 = sshll.u32 %s5272_s17, 4  ;;  %s413_s18 = int_to_ptr.vmem [resolvable:$true] %s412_s18  ;;  %s451_s14 = int_to_ptr.vmem [resolvable:$true] %s450_s14 }
  0x4e   : > { %s5103_s30 = scalar_lea.hbm %s5889_s3, 768 }
  0x4f   : > { %p5104_p6 = scmp.ne.s32.totalorder %s5889_s3, %s5103_s30  ;;  %p5110_p5 = scmp.lt.u32.totalorder %s5103_s30, %s5889_s3 }
  0x51   : > { %p5106_p10 = pnand %p5104_p6, %p5431_p13 }
  0x53   : > { %p5107_p3 = pneg %p5106_p10 }
  0x55   : > { %p5112_p7 = pnand %p5110_p5, %p5107_p3 }
  0x57   : > { %5115 = shalt.err (!%p5112_p7)
}
  0x58   : > { %s5116_s29 = scalar_lea.vmem %s413_s18, 768  ;;  %p5124_p2 = scmp.lt.s32.totalorder %s413_s18, %s413_s18 }
  0x59   : > { %p5117_p9 = scmp.ne.s32.totalorder %s413_s18, %s5116_s29  ;;  %p5125_p1 = scmp.lt.s32.totalorder %s5116_s29, %s5116_s29 }
  0x5b   : > { %p5119_p12 = pnand %p5117_p9, %p5431_p13  ;;  %p5126_p4 = por %p5125_p1, %p5124_p2 }
  0x5d   : > { %p5120_p0 = pneg %p5119_p12 }
  0x5f   : > { %p5127_p8 = pnand %p5126_p4, %p5120_p0 }
  0x61   : > { %5130 = shalt.err (!%p5127_p8)
}
  0x62   : > { %s5273_s1 = smov 4   ;;  %s5131_s15 = scalar_lea.hbm %s5895_s9, 16384 }
  0x63   : > { %4773 = dma.hbm_to_vmem [thread:$0]  (!%p5417_p11), %s5889_s3, 768, %s413_s18, [#allocation6], %s5270_s10, %s5270_s10, %s5273_s1  }
  0x64   : > { %p5132_p4 = scmp.ne.s32.totalorder %s5895_s9, %s5131_s15  ;;  %p5138_p10 = scmp.lt.u32.totalorder %s5131_s15, %s5895_s9 }
  0x66   : > { %p5134_p8 = pnand %p5132_p4, %p5431_p13 }
  0x68   : > { %p5135_p6 = pneg %p5134_p8 }
  0x6a   : > { %p5140_p3 = pnand %p5138_p10, %p5135_p6 }
  0x6c   : > { %5143 = shalt.err (!%p5140_p3)
}
  0x6d   : > { %s5144_s30 = scalar_lea.vmem %s451_s14, 16384  ;;  %p5152_p12 = scmp.lt.s32.totalorder %s451_s14, %s451_s14 }
  0x6e   : > { %p5145_p5 = scmp.ne.s32.totalorder %s451_s14, %s5144_s30  ;;  %p5153_p0 = scmp.lt.s32.totalorder %s5144_s30, %s5144_s30 }
  0x70   : > { %p5147_p7 = pnand %p5145_p5, %p5431_p13  ;;  %p5154_p2 = por %p5153_p0, %p5152_p12 }
  0x72   : > { %p5148_p9 = pneg %p5147_p7 }
  0x74   : > { %p5155_p1 = pnand %p5154_p2, %p5148_p9 }
  0x76   : > { %5158 = shalt.err (!%p5155_p1)
}
  0x77   : > { %4779 = dma.hbm_to_vmem [thread:$0]  (!%p5417_p11), %s5895_s9, 16384, %s451_s14, [#allocation9], %s5270_s10, %s5270_s10, %s5273_s1  }
  0x78   : > { %s5517_s23 = sadd.s32 1, %s5263_s21   ;;  %s40_s29 = sadd.s32 1, %s5259_s20 }
  0x79   : > { %s37_s27 = ssub.s32 %s5263_s21, %s5517_s23  ;;  %p47_p4 = scmp.ne.s32.totalorder %s5259_s20, %s5255_s19 }
  0x7a   : > { %p38_p13 = scmp.eq.s32.totalorder %s37_s27, 0  ;;  %p48_p8 = scmp.eq.s32.totalorder %s5263_s21, 0 }
  0x7b   : > { %p4792_p6 = scmp.lt.s32.totalorder %s5263_s21, 2  ;;  %p5924_p3 = scmp.eq.s32.totalorder %s5387_s13, 1 }
  0x7c   : > { %s5527_s6 = scalar_select %p38_p13, %s5259_s20, %s40_s29  }
  0x7d   : > { %p49_p10 = por %p48_p8, %p47_p4  ;;  %p5531_p5 = por %p5924_p3, %p47_p4 }
  0x7e   : > { %s479_s11 = sand.u32 1, %s5259_s20   ;;  %s4469_s12 = sshll.u32 %s5263_s21, 8 }
  0x7f   : > { %s4154_s10 = sshll.u32 %s479_s11, 4  ;;  %s5540_s15 = scalar_lea.hbm %s5886_s0, %s4469_s12 }
  0x80   : > { %s483_s16 = scalar_lea.vmem [#allocation2], %s4154_s10  ;;  %p5542_p11 = pnand %p4792_p6, %p49_p10 }
  0x81   : > { %s490_s17 = sshll.u32 %s483_s16, 4  ;;  %s5548_s28 = scalar_lea.sflag [#allocation3], %s479_s11  ;;  %s5546_s17 = int_to_ptr.vmem [resolvable:$true] %s490_s17 }
  0x82   : > { %s5159_s30 = scalar_lea.hbm %s5540_s15, 256  ;;  %p5161_p9 = pneg %p5542_p11 }
  0x83   : > { %p5160_p7 = scmp.ne.s32.totalorder %s5540_s15, %s5159_s30  ;;  %s5164_s27 = scalar_lea.hbm %s5886_s0, 512 }
  0x84   : > { %p5165_p2 = scmp.lt.u32.totalorder %s5540_s15, %s5886_s0  ;;  %p5166_p1 = scmp.lt.u32.totalorder %s5164_s27, %s5159_s30 }
  0x85   : > { %p5162_p12 = pnand %p5161_p9, %p5160_p7  ;;  %p5168_p4 = scmp.lt.u32.totalorder %s5159_s30, %s5540_s15 }
  0x86   : > { %p5167_p13 = por %p5166_p1, %p5165_p2 }
  0x87   : > { %p5163_p0 = pneg %p5162_p12 }
  0x88   : > { %p5169_p8 = por %p5168_p4, %p5167_p13 }
  0x8a   : > { %p5170_p6 = pnand %p5169_p8, %p5163_p0 }
  0x8c   : > { %5173 = shalt.err (!%p5170_p6)
}
  0x8d   : > { %s5174_s11 = scalar_lea.vmem %s5546_s17, 256  ;;  %s5274_s10 = smov [#allocation2]  }
  0x8e   : > { %p5175_p10 = scmp.ne.s32.totalorder %s5546_s17, %s5174_s11  ;;  %s5179_s14 = sshll.u32 %s5274_s10, 4  ;;  %s5180_s14 = int_to_ptr.vmem [resolvable:$false] %s5179_s14 }
  0x8f   : > { %s5181_s1 = scalar_lea.vmem %s5180_s14, 512  ;;  %p5182_p12 = scmp.lt.s32.totalorder %s5546_s17, %s5180_s14 }
  0x90   : > { %p5177_p3 = pnand %p5175_p10, %p5161_p9  ;;  %p5183_p2 = scmp.lt.s32.totalorder %s5181_s1, %s5174_s11 }
  0x92   : > { %p5178_p7 = pneg %p5177_p3  ;;  %p5184_p1 = por %p5183_p2, %p5182_p12 }
  0x94   : > { %p5185_p13 = pnand %p5184_p1, %p5178_p7 }
  0x96   : > { %5188 = shalt.err (!%p5185_p13)
}
  0x97   : > { %s5275_s16 = smov 128   ;;  %s5276_s30 = smov 8  }
  0x98   : > { %4783 = dma.hbm_to_vmem [thread:$0]  (!%p5542_p11), %s5540_s15, 256, %s5546_s17, %s5548_s28, %s5275_s16, %s5275_s16, %s5276_s30  }
  0x99   : > { %p5927_p9 = scmp.ne.s32.totalorder %s5920_s24, 0 }
  0x9a   : > { %s5579_s18 = sand.u32 (!%p5927_p9), 1, %s5255_s19   ;;  %p5928_p0 = scmp.ne.s32.totalorder (!%p5927_p9), %s5917_s22, 0 }
  0x9b   : > { %502 = sbr.rel (%p5927_p9) target bundleno = 3314 (0xcf2), region = 80  ;;  %s4158_s26 = sshll.u32 (!%p5927_p9), %s5579_s18, 4 }
  0x9c   : > { %s505_s27 = scalar_lea.sflag (!%p5927_p9), [#allocation3], %s5579_s18  ;;  %s5585_s29 = scalar_lea.vmem (!%p5927_p9), [#allocation2], %s4158_s26 }
  0xa2   : > { %5234 = dma.done.wait (%p5928_p0), %s505_s27, 256  }
  0xa3   : > { %5236 = vsyncadd (%p5928_p0), %s505_s27, 4294967040  ;;  %p5929_p11 = scmp.eq.s32.totalorder %s5387_s13, 0 }
  0xa5   : > { %5238 = dma.done.wait (%p5929_p11), [#allocation6], 3840   ;;  %p5930_p4 = pmov %p5929_p11 }
  0xa7   : > { %5240 = vsyncadd (%p5930_p4), [#allocation6], 4294963456  ;;  %p5931_p8 = pmov %p5930_p4 }
  0xa8   : > { %p5932_p6 = pmov %p5930_p4 }
  0xa9   : > { %5242 = dma.done.wait (%p5931_p8), [#allocation9], 32768  }
  0xaa   : > { %5244 = vsyncadd (%p5932_p6), [#allocation9], 4294934528  ;;  %v5277_v0 = vmov 0   ;;  %v4849_v1 = vld [vmem:[#allocation5 + $0x4] ss:$12 sps:$4 sm:$0xff]   ;;  %v5604_v18 = vld [vmem:[%s5585_s29 + $0x8] sm:$0xff]  ;;  %v575_v29 = vlaneseq }
  0xab   : > { %789 = vmatprep.mubr.bf16.mxu0 %v5277_v0  ;;  %v4851_v2 = vld [vmem:[#allocation5] ss:$12 sps:$4 sm:$0xff]   ;;  %757 = vmatprep.subr.bf16.mxu0 %v4849_v1  ;;  %v4852_v3 = vld [vmem:[#allocation5 + $0x1c] ss:$12 sps:$4 sm:$0xff]   ;;  %v4854_v4 = vld [vmem:[#allocation5 + $0x18] ss:$12 sps:$4 sm:$0xff]  }
  0xac   : > { %758 = vmatpush1.bf16.msra.mxu0 %v4851_v2  ;;  %v4855_v5 = vld [vmem:[#allocation5 + $0x34] ss:$12 sps:$4 sm:$0xff]   ;;  %v4857_v6 = vld [vmem:[#allocation5 + $0x30] ss:$12 sps:$4 sm:$0xff]   ;;  %v4858_v7 = vld [vmem:[#allocation5 + $0x4c] ss:$12 sps:$4 sm:$0xff]  }
  0xad   : > { %759 = vmatprep.subr.bf16.mxu0 %v4852_v3  ;;  %v4860_v8 = vld [vmem:[#allocation5 + $0x48] ss:$12 sps:$4 sm:$0xff]   ;;  %v4861_v9 = vld [vmem:[#allocation5 + $0x64] ss:$12 sps:$4 sm:$0xff]   ;;  %v4863_v10 = vld [vmem:[#allocation5 + $0x60] ss:$12 sps:$4 sm:$0xff]  }
  0xae   : > { %v4864_v11 = vld [vmem:[#allocation5 + $0x7c] ss:$12 sps:$4 sm:$0xff]   ;;  %v4866_v12 = vld [vmem:[#allocation5 + $0x78] ss:$12 sps:$4 sm:$0xff]   ;;  %v4867_v13 = vld [vmem:[#allocation5 + $0x94] ss:$12 sps:$4 sm:$0xff]  }
  0xaf   : > { %v4869_v14 = vld [vmem:[#allocation5 + $0x90] ss:$12 sps:$4 sm:$0xff]   ;;  %v4870_v15 = vld [vmem:[#allocation5 + $0xac] ss:$12 sps:$4 sm:$0xff]   ;;  %v4872_v16 = vld [vmem:[#allocation5 + $0xa8] ss:$12 sps:$4 sm:$0xff]  }
  0xb0   : > { %760 = vmatpush1.bf16.msra.mxu0 %v4854_v4  ;;  %v5601_v17 = vld [vmem:[%s5585_s29] sm:$0xff]  ;;  %v5278_v20 = vmov 0.0   ;;  %vm5279_vm0 = vmmov 0   ;;  %v5625_v30 = vshrl.u32 %v575_v29, 7  ;;  %vm846_vm1 = vcmask 261120   ;;  %s5280_s15 = smov 32  }
  0xb1   : > { %761 = vmatprep.subr.bf16.mxu0 %v4855_v5  ;;  %v574_v19 = vpack.c.bf16 %v5604_v18, %v5601_v17  ;;  %4675 = vmatprep.subr.bf16.mxu1 %v5278_v20  ;;  %v4873_v21 = vld [vmem:[#allocation5 + $0x8] ss:$12 sps:$4 sm:$0xff]   ;;  %v4874_v22 = vld [vmem:[#allocation5 + $0x20] ss:$12 sps:$4 sm:$0xff]   ;;  %v4875_v23 = vld [vmem:[#allocation5 + $0x38] ss:$12 sps:$4 sm:$0xff]  }
  0xb2   : > { %4676 = vmatpush3.bf16.msra.mxu1 %v4873_v21  ;;  %4691 = vmatprep.mubr.msk.bf16.mxu1 %vm5279_vm0, %v5278_v20  ;;  %v4876_v24 = vld [vmem:[#allocation5 + $0x50] ss:$12 sps:$4 sm:$0xff]   ;;  %v4877_v25 = vld [vmem:[#allocation5 + $0x68] ss:$12 sps:$4 sm:$0xff]   ;;  %v4878_v26 = vld [vmem:[#allocation5 + $0x80] ss:$12 sps:$4 sm:$0xff]  }
  0xb3   : > { %4677 = vmatprep.subr.bf16.mxu1 %v5278_v20  ;;  %v4879_v27 = vld [vmem:[#allocation5 + $0x98] ss:$12 sps:$4 sm:$0xff]   ;;  %v4880_v28 = vld [vmem:[#allocation5 + $0xb0] ss:$12 sps:$4 sm:$0xff]   ;;  %v5628_v31 = vsub.s32 0, %v5625_v30  ;;  %v5634_v33 = vsub.s32 1, %v5625_v30 }
  0xb4   : > { %762 = vmatpush1.bf16.msra.mxu0 %v4857_v6  ;;  %v612_v32 = vld [vmem:[%s5888_s2] sm:$0x7]  ;;  %s5281_s17 = smov 96   ;;  %s5282_s25 = smov 64   ;;  %v5647_v48 = vsub.s32 2, %v5625_v30  ;;  %vm894_vm2 = vcmask 130048  }
  0xb5   : > { %763 = vmatprep.subr.bf16.mxu0 %v4858_v7  ;;  %v617_v34 = vrot.slane %v612_v32, %v5628_v31  ;;  %v621_v36 = vrot.slane %v612_v32, %v5634_v33  ;;  %vm1216_vm3 = vcmask 523264   ;;  %vm1274_vm4 = vcmask 785408   ;;  %s5933_s16 = sld [smem:[#allocation19_spill]]  ;;  %s5934_s29 = sld [smem:[#allocation20_spill]] }
  0xb6   : > { %4678 = vmatpush3.bf16.msra.mxu1 %v4874_v22  ;;  %v625_v52 = vrot.slane %v612_v32, %v5647_v48  ;;  %s5935_s10 = sld [smem:[#allocation21_spill]]  ;;  %s5937_s22 = sld [smem:[#allocation23_spill]] }
  0xb7   : > { %4679 = vmatprep.subr.bf16.mxu1 %v5278_v20  ;;  %s4470_s24 = sshll.u32 %s5387_s13, 8  ;;  %s5938_s12 = sld [smem:[#allocation24_spill]] }
  0xb8   : > { %764 = vmatpush1.bf16.msra.mxu0 %v4860_v8 }
  0xb9   : > { %765 = vmatprep.subr.bf16.mxu0 %v4861_v9 }
  0xba   : > { %4680 = vmatpush3.bf16.msra.mxu1 %v4875_v23 }
  0xbb   : > { %4681 = vmatprep.subr.bf16.mxu1 %v5278_v20 }
  0xbc   : > { %766 = vmatpush1.bf16.msra.mxu0 %v4863_v10 }
  0xbd   : > { %767 = vmatprep.subr.bf16.mxu0 %v4864_v11  ;;  %s5840_s11 = scalar_lea.hbm %s5938_s12, %s4470_s24 }
  0xbe   : > { %4682 = vmatpush3.bf16.msra.mxu1 %v4876_v24 }
  0xbf   : > { %4683 = vmatprep.subr.bf16.mxu1 %v5278_v20 }
  0xc0   : > { %768 = vmatpush1.bf16.msra.mxu0 %v4866_v12 }
  0xc1   : > { %769 = vmatprep.subr.bf16.mxu0 %v4867_v13 }
  0xc2   : > { %4684 = vmatpush3.bf16.msra.mxu1 %v4877_v25 }
  0xc3   : > { %4685 = vmatprep.subr.bf16.mxu1 %v5278_v20 }
  0xc4   : > { %770 = vmatpush1.bf16.msra.mxu0 %v4869_v14 }
  0xc5   : > { %771 = vmatprep.subr.bf16.mxu0 %v4870_v15 }
  0xc6   : > { %4686 = vmatpush3.bf16.msra.mxu1 %v4878_v26 }
  0xc7   : > { %4687 = vmatprep.subr.bf16.mxu1 %v5278_v20 }
  0xc8   : > { %772 = vmatpush1.bf16.msra.mxu0 %v4872_v16 }
  0xc9   : > { %4707 = vmatprep.subr.bf16.mxu0 %v5278_v20 }
  0xca   : > { %4688 = vmatpush3.bf16.msra.mxu1 %v4879_v27 }
  0xcb   : > { %790 = vmatmul.mubr.bf16.vlgmr.msra.gmra.mrb[0].mxu0 %v574_v19  ;;  %4689 = vmatprep.subr.bf16.mxu1 %v5278_v20 }
  0xcc   : > { %4709 = vmatprep.mubr.msk.bf16.mxu0 %vm5279_vm0, %v5278_v20 }
  0xce   : > { %4690 = vmatpush3.bf16.msra.mxu1 %v4880_v28 }
  0xcf   : > { %4695 = vmatprep.subr.bf16.mxu1 %v5278_v20 }
  0xd1   : > { %4692 = vmatmul.mubr.bf16.vlgmr.msra.gmra.mrb[0].mxu1 %v574_v19 }
  0xd2   : > { %4697 = vmatprep.mubr.msk.bf16.mxu1 %vm5279_vm0, %v5278_v20 }
 0x19e   : > { %v791_v35 = vpop.f32.mrb[0].mxu0 }
 0x19f   : > { %v793_v37 = vpop.f32.mrb[1].mxu0  ;;  %v792_v39 = vadd.f32 %v791_v35, %v617_v34 }
 0x1a0   : > { %v795_v38 = vpop.f32.mrb[2].mxu0  ;;  %v794_v42 = vadd.f32 %v793_v37, %v621_v36 }
 0x1a1   : > { %v796_v40 = vadd.f32 %v795_v38, %v617_v34  ;;  %v797_v41 = vpop.f32.mrb[3].mxu0 }
 0x1a2   : > { %v798_v43 = vadd.f32 %v797_v41, %v621_v36 }
 0x1a3   : > { %v841_v44 = vpack.c.bf16 %v796_v40, %v792_v39 }
 0x1a4   : > { %v5638_v45 = vpack.c.bf16 %v798_v43, %v794_v42  ;;  %v834_v54 = vpop.f32.mrb[0].mxu1 }
 0x1a5   : > { %844 = vrot.lane.b32.xlu0 %v841_v44, %s5280_s15  ;;  %v5657_v55 = vadd.f32 %v834_v54, %v625_v52  ;;  %v4693_v56 = vpop.f32.mrb[1].mxu1 }
 0x1a6   : > { %1090 = vrot.lane.b32.xlu1 %v5638_v45, %s5281_s17  ;;  %v973_v46 = vsel %vm846_vm1, %v5638_v45, 0  ;;  %v837_v57 = vpop.f32.mrb[2].mxu1 }
 0x1a7   : > { %4708 = vmatpush3.bf16.xpose.msra.mxu0 %v973_v46  ;;  %v5660_v58 = vadd.f32 %v837_v57, %v625_v52  ;;  %v4694_v59 = vpop.f32.mrb[3].mxu1 }
 0x1a8   : > { %4719 = vmatprep.subr.bf16.mxu0 %v5278_v20 }
 0x1a9   : > { %967 = vrot.lane.b32.xlu0 %v841_v44, %s5281_s17  ;;  %v1087_v61 = vpack.c.bf16 %v5660_v58, %v5657_v55  ;;  %v4884_v55 = vld [vmem:[#allocation7 + $0x18] sm:$0xff]  }
 0x1aa   : > { %1088 = vrot.lane.b32.xlu1 %v841_v44, %s5282_s25 }
 0x217   : > { %v845_v47 = vpop.permute.xlu0 %844 }
 0x218   : > { %v851_v49 = vsel %vm846_vm1, %v845_v47, 0  ;;  %v1091_v50 = vpop.permute.xlu1 %1090 }
 0x219   : > { %4696 = vmatpush3.bf16.xpose.msra.mxu1 %v851_v49  ;;  %v1096_v53 = vsel %vm846_vm1, %v1091_v50, 0 }
 0x21a   : > { %4701 = vmatprep.subr.bf16.mxu1 %v5278_v20 }
 0x21b   : > { %v968_v51 = vpop.permute.xlu0 %967 }
 0x21c   : > { %4710 = vmatmul.mubr.msk.bf16.vlgmr.msra.gmra.mrb[4].mxu0 %vm846_vm1, %v968_v51  ;;  %v1089_v60 = vpop.permute.xlu1 %1088 }
 0x21d   : > { %4720 = vmatpush3.bf16.xpose.msra.mxu0 %v1096_v53  ;;  %4721 = vmatprep.mubr.msk.bf16.mxu0 %vm5279_vm0, %v5278_v20 }
 0x21e   : > { %4731 = vmatprep.subr.bf16.mxu0 %v5278_v20 }
 0x220   : > { %4698 = vmatmul.mubr.msk.bf16.vlgmr.msra.gmra.mrb[4].mxu1 %vm846_vm1, %v841_v44 }
 0x221   : > { %4703 = vmatprep.mubr.msk.bf16.mxu1 %vm5279_vm0, %v5278_v20 }
 0x224   : > { %4722 = vmatmul.mubr.msk.bf16.vlgmr.msra.gmra.mrb[8].mxu0 %vm846_vm1, %v1089_v60 }
 0x225   : > { %4743 = vmatprep.mubr.msk.bf16.mxu0 %vm5279_vm0, %v5278_v20 }
 0x2ef   : > { %v1009_v62 = vpop.f32.mrb[4].mxu0 }
 0x2f0   : > { %v4711_v63 = vpop.f32.mrb[5].mxu0  ;;  %v1016_v11 = vsel %vm894_vm2, %v1009_v62, -inf }
 0x2f1   : > { %v1012_v1 = vpop.f32.mrb[6].mxu0 }
 0x2f2   : > { %v4712_v2 = vpop.f32.mrb[7].mxu0  ;;  %v1019_v15 = vsel %vm894_vm2, %v1012_v1, -inf }
 0x2f3   : > { %v887_v3 = vpop.f32.mrb[4].mxu1 }
 0x2f4   : > { %v4699_v4 = vpop.f32.mrb[5].mxu1  ;;  %v895_v5 = vsel %vm894_vm2, %v887_v3, -inf }
 0x2f5   : > { %896 = vmax.xlane.f32.xlu0 %v895_v5  ;;  %v890_v6 = vpop.f32.mrb[6].mxu1 }
 0x2f6   : > { %v4700_v7 = vpop.f32.mrb[7].mxu1  ;;  %v898_v8 = vsel %vm894_vm2, %v890_v6, -inf }
 0x2f7   : > { %899 = vmax.xlane.f32.xlu1 %v898_v8  ;;  %v1132_v9 = vpop.f32.mrb[8].mxu0 }
 0x2f8   : > { %v4723_v10 = vpop.f32.mrb[9].mxu0  ;;  %v1139_v14 = vsel %vm894_vm2, %v1132_v9, -inf }
 0x2f9   : > { %1017 = vmax.xlane.f32.xlu0 %v1016_v11  ;;  %v1135_v12 = vpop.f32.mrb[10].mxu0 }
 0x2fa   : > { %v4724_v13 = vpop.f32.mrb[11].mxu0  ;;  %v1142_v16 = vsel %vm894_vm2, %v1135_v12, -inf }
 0x2fb   : > { %1140 = vmax.xlane.f32.xlu1 %v1139_v14 }
 0x2fd   : > { %1020 = vmax.xlane.f32.xlu0 %v1019_v15 }
 0x301   : > { %1143 = vmax.xlane.f32.xlu0 %v1142_v16 }
 0x382   : > { %v897_v19 = vpop.xlane.xlu0 %896 }
 0x383   : > { %v901_v22 = vsub.f32 %v887_v3, %v897_v19 }
 0x384   : > { %v900_v21 = vpop.xlane.xlu1 %899 }
 0x385   : > { %v902_v25 = vsub.f32 %v890_v6, %v900_v21  ;;  %v903_v27 = vmul.f32 1.442695, %v901_v22  ;;  %v4881_v21 = vld [vmem:[#allocation7] sm:$0xff]   ;;  %v4882_v22 = vld [vmem:[#allocation7 + $0x8] sm:$0xff]  }
 0x386   : > { %v1018_v23 = vpop.xlane.xlu0 %1017  ;;  %4732 = vmatpush3.bf16.msra.mxu0 %v4881_v21 }
 0x387   : > { %v1022_v24 = vsub.f32 %v1009_v62, %v1018_v23  ;;  %v905_v36 = vmul.f32 1.442695, %v902_v25  ;;  %4733 = vmatprep.subr.bf16.mxu0 %v5278_v20  ;;  %v4883_v23 = vld [vmem:[#allocation7 + $0x10] sm:$0xff]  }
 0x388   : > { %v1141_v26 = vpop.xlane.xlu1 %1140 }
 0x389   : > { %v1024_v28 = vmul.f32 1.442695, %v1022_v24  ;;  %v1145_v32 = vsub.f32 %v1132_v9, %v1141_v26  ;;  %v4886_v26 = vld [vmem:[#allocation7 + $0x28] sm:$0xff]  }
 0x38a   : > { %v1021_v34 = vpop.xlane.xlu0 %1020  ;;  %4734 = vmatpush3.bf16.msra.mxu0 %v4882_v22 }
 0x38b   : > { %5015 = vpow2.f32 %v1024_v28  ;;  %v1023_v35 = vsub.f32 %v1012_v1, %v1021_v34  ;;  %v1147_v37 = vmul.f32 1.442695, %v1145_v32  ;;  %4735 = vmatprep.subr.bf16.mxu0 %v5278_v20 }
 0x38c   : > { %5017 = vpow2.f32 %v903_v27 }
 0x38d   : > { %v1026_v38 = vmul.f32 1.442695, %v1023_v35 }
 0x38e   : > { %v1144_v39 = vpop.xlane.xlu0 %1143  ;;  %4736 = vmatpush3.bf16.msra.mxu0 %v4883_v23 }
 0x38f   : > { %5019 = vpow2.f32 %v1026_v38  ;;  %v1146_v40 = vsub.f32 %v1135_v12, %v1144_v39  ;;  %4737 = vmatprep.subr.bf16.mxu0 %v5278_v20 }
 0x390   : > { %5021 = vpow2.f32 %v905_v36 }
 0x391   : > { %5023 = vpow2.f32 %v1147_v37  ;;  %v1149_v41 = vmul.f32 1.442695, %v1146_v40 }
 0x392   : > { %4738 = vmatpush3.bf16.msra.mxu0 %v4884_v55 }
 0x393   : > { %5025 = vpow2.f32 %v1149_v41  ;;  %4739 = vmatprep.subr.bf16.mxu0 %v5278_v20 }
 0x395   : > { %v5016_v42 = vpop.eup %5015 }
 0x396   : > { %v1028_v43 = vsel %vm894_vm2, %v5016_v42, 0.0  ;;  %v5018_v44 = vpop.eup %5017 }
 0x397   : > { %1029 = vadd.xlane.f32.xlu1 %v1028_v43  ;;  %v907_v49 = vsel %vm894_vm2, %v5018_v44, 0.0 }
 0x399   : > { %v5020_v46 = vpop.eup %5019 }
 0x39a   : > { %v5022_v47 = vpop.eup %5021  ;;  %v1031_v50 = vsel %vm894_vm2, %v5020_v46, 0.0 }
 0x39b   : > { %v5024_v51 = vpop.eup %5023  ;;  %908 = vadd.xlane.f32.xlu1 %v907_v49  ;;  %1032 = vadd.xlane.f32.xlu0 %v1031_v50  ;;  %v910_v53 = vsel %vm894_vm2, %v5022_v47, 0.0  ;;  %v4195_v49 = vld [vmem:[%s5890_s4] ss:$0 sm:$0xff] }
 0x39c   : > { %v1151_v52 = vsel %vm894_vm2, %v5024_v51, 0.0 }
 0x39d   : > { %v5026_v54 = vpop.eup %5025 }
 0x39e   : > { %v1154_v56 = vsel %vm894_vm2, %v5026_v54, 0.0 }
 0x39f   : > { %1152 = vadd.xlane.f32.xlu1 %v1151_v52  ;;  %911 = vadd.xlane.f32.xlu0 %v910_v53 }
 0x3a3   : > { %1155 = vadd.xlane.f32.xlu0 %v1154_v56 }
 0x3b0   : > { %919 = vrot.lane.b32.xlu1 %v5638_v45, %s5282_s25 }
 0x3b9   : > { %1039 = vrot.lane.b32.xlu0 %v5638_v45, %s5280_s15 }
 0x424   : > { %v1030_v57 = vpop.xlane.xlu1 %1029 }
 0x428   : > { %v909_v59 = vpop.xlane.xlu1 %908  ;;  %v1033_v60 = vpop.xlane.xlu0 %1032 }
 0x429   : > { %5027 = vrcp.f32 %v909_v59 }
 0x42c   : > { %v1153_v62 = vpop.xlane.xlu1 %1152  ;;  %v912_v63 = vpop.xlane.xlu0 %911 }
 0x42d   : > { %5029 = vrcp.f32 %v912_v63  ;;  %v1364_v63 = vld [vmem:[#allocation8 + $0x8] sm:$0xff] }
 0x42e   : > { %5031 = vrcp.f32 %v1033_v60  ;;  %v1363_v60 = vld [vmem:[#allocation8] sm:$0xff] }
 0x42f   : > { %5033 = vrcp.f32 %v1030_v57 }
 0x430   : > { %v920_v1 = vpop.permute.xlu1 %919  ;;  %v1156_v3 = vpop.xlane.xlu0 %1155 }
 0x431   : > { %4702 = vmatpush3.bf16.msra.mxu1 %v920_v1  ;;  %5035 = vrcp.f32 %v1156_v3  ;;  %v1366_v3 = vld [vmem:[#allocation8 + $0x48] sm:$0xff] }
 0x432   : > { %4713 = vmatprep.subr.bf16.mxu1 %v5278_v20  ;;  %5037 = vrcp.f32 %v1153_v62  ;;  %v1365_v62 = vld [vmem:[#allocation8 + $0x40] sm:$0xff] }
 0x433   : > { %v5028_v2 = vpop.eup %5027  ;;  %v4205_v1 = vcombine.low %v1363_v60, %v1365_v62 }
 0x434   : > { %v915_v5 = vmul.f32 %v5028_v2, %v5018_v44  ;;  %v1040_v8 = vpop.permute.xlu0 %1039  ;;  %v4206_v2 = vcombine.high %v1363_v60, %v1365_v62  ;;  %v1387_v62 = vld [vmem:[#allocation8 + $0x300] sm:$0xff] }
 0x437   : > { %v5030_v4 = vpop.eup %5029 }
 0x438   : > { %v916_v6 = vmul.f32 %v5030_v4, %v5022_v47  ;;  %v5032_v7 = vpop.eup %5031  ;;  %v1367_v4 = vld [vmem:[#allocation8 + $0x80] sm:$0xff] }
 0x439   : > { %v5034_v9 = vpop.eup %5033  ;;  %v1037_v10 = vmul.f32 %v5032_v7, %v5020_v46 }
 0x43a   : > { %v917_v45 = vpack.c.bf16 %v916_v6, %v915_v5  ;;  %v1036_v11 = vmul.f32 %v5034_v9, %v5016_v42  ;;  %v1369_v5 = vld [vmem:[#allocation8 + $0xc0] sm:$0xff]  ;;  %v4207_v6 = vcombine.low %v1364_v63, %v1366_v3  ;;  %v1370_v9 = vld [vmem:[#allocation8 + $0xc8] sm:$0xff] }
 0x43b   : > { %v5036_v13 = vpop.eup %5035  ;;  %v4210_v7 = vcombine.high %v1367_v4, %v1369_v5 }
 0x43c   : > { %4704 = vmatmul.mubr.msk.bf16.vlgmr.msra.gmra.mrb[8].mxu1 %vm894_vm2, %v917_v45  ;;  %v1038_v12 = vpack.c.bf16 %v1037_v10, %v1036_v11  ;;  %v5038_v14 = vpop.eup %5037  ;;  %v1160_v15 = vmul.f32 %v5036_v13, %v5026_v54  ;;  %v4208_v45 = vcombine.high %v1364_v63, %v1366_v3  ;;  %v576_v11 = vand.u32 127, %v575_v29  ;;  %v1389_v63 = vld [vmem:[#allocation8 + $0x340] sm:$0xff]  ;;  %v1390_v3 = vld [vmem:[#allocation8 + $0x348] sm:$0xff] }
 0x43d   : > { %4714 = vmatpush3.bf16.msra.mxu1 %v1040_v8  ;;  %4715 = vmatprep.mubr.msk.bf16.mxu1 %vm5279_vm0, %v5278_v20  ;;  %v1159_v16 = vmul.f32 %v5038_v14, %v5024_v51  ;;  %v1368_v8 = vld [vmem:[#allocation8 + $0x88] sm:$0xff] }
 0x43e   : > { %4725 = vmatprep.subr.bf16.mxu1 %v5278_v20  ;;  %v4212_v10 = vcombine.high %v1368_v8, %v1370_v9  ;;  %vm577_vm5 = vcmp.lt.s32.totalorder %v576_v11, 96 }
 0x43f   : > { %v1161_v19 = vpack.c.bf16 %v1160_v15, %v1159_v16  ;;  %v5714_v15 = vsel %vm577_vm5, 1.0, %v5278_v20 }
 0x444   : > { %4716 = vmatmul.mubr.msk.bf16.vlgmr.msra.gmra.mrb[12].mxu1 %vm894_vm2, %v1038_v12 }
 0x445   : > { %4726 = vmatpush3.bf16.msra.mxu1 %v1087_v61  ;;  %4727 = vmatprep.mubr.msk.bf16.mxu1 %vm5279_vm0, %v5278_v20  ;;  %v4885_v61 = vld [vmem:[#allocation7 + $0x20] sm:$0xff]  }
 0x446   : > { %4740 = vmatpush3.bf16.msra.mxu0 %v4885_v61  ;;  %1577 = vmatprep.subr.bf16.mxu1 %v4206_v2  ;;  %v1372_v61 = vld [vmem:[#allocation8 + $0x108] sm:$0xff]  ;;  %v4230_v2 = vcombine.high %v1387_v62, %v1389_v63 }
 0x447   : > { %4741 = vmatprep.subr.bf16.mxu0 %v5278_v20  ;;  %v1373_v20 = vld [vmem:[#allocation8 + $0x140] sm:$0xff] }
 0x44a   : > { %4742 = vmatpush3.bf16.msra.mxu0 %v4886_v26 }
 0x44b   : > { %1620 = vmatprep.subr.bf16.mxu0 %v4208_v45  ;;  %v1391_v45 = vld [vmem:[#allocation8 + $0x380] sm:$0xff] }
 0x44c   : > { %4728 = vmatmul.mubr.msk.bf16.vlgmr.msra.gmra.mrb[16].mxu1 %vm894_vm2, %v1161_v19 }
 0x44d   : > { %1609 = vmatprep.mubr.bf16.mxu1 %v5277_v0  ;;  %1578 = vmatpush1.bf16.msra.mxu1 %v4205_v1  ;;  %v1388_v1 = vld [vmem:[#allocation8 + $0x308] sm:$0xff] }
 0x44e   : > { %1579 = vmatprep.subr.bf16.mxu1 %v4210_v7  ;;  %v1393_v7 = vld [vmem:[#allocation8 + $0x3c0] sm:$0xff] }
 0x50f   : > { %v959_v58 = vpop.f32.mrb[8].mxu1 }
 0x510   : > { %v4705_v24 = vpop.f32.mrb[9].mxu1 }
 0x511   : > { %v962_v25 = vpop.f32.mrb[10].mxu1 }
 0x512   : > { %v966_v27 = vpack.c.bf16 %v962_v25, %v959_v58  ;;  %v4706_v28 = vpop.f32.mrb[11].mxu1  ;;  %v1371_v58 = vld [vmem:[#allocation8 + $0x100] sm:$0xff]  ;;  %v1374_v25 = vld [vmem:[#allocation8 + $0x148] sm:$0xff] }
 0x513   : > { %v4214_v24 = vcombine.high %v1371_v58, %v1373_v20  ;;  %v4213_v26 = vcombine.low %v1371_v58, %v1373_v20  ;;  %v4216_v28 = vcombine.high %v1372_v61, %v1374_v25 }
 0x517   : > { %v1079_v32 = vpop.f32.mrb[12].mxu1 }
 0x518   : > { %v4717_v34 = vpop.f32.mrb[13].mxu1 }
 0x519   : > { %v1082_v35 = vpop.f32.mrb[14].mxu1  ;;  %v1377_v34 = vld [vmem:[#allocation8 + $0x1c0] sm:$0xff] }
 0x51a   : > { %v1086_v36 = vpack.c.bf16 %v1082_v35, %v1079_v32  ;;  %v4718_v37 = vpop.f32.mrb[15].mxu1  ;;  %v1375_v32 = vld [vmem:[#allocation8 + $0x180] sm:$0xff]  ;;  %v1376_v35 = vld [vmem:[#allocation8 + $0x188] sm:$0xff] }
 0x51b   : > { %v1378_v37 = vld [vmem:[#allocation8 + $0x1c8] sm:$0xff] }
 0x51c   : > { %1208 = vrot.lane.b32.xlu1 %v1086_v36, %s5280_s15  ;;  %v4218_v36 = vcombine.high %v1375_v32, %v1377_v34  ;;  %s570_s15 = scalar_lea.vmem [#allocation11], %s4158_s26  ;;  %s5283_s26 = smov [#allocation11]  }
 0x51d   : > { %s4036_s17 = sshll.u32 %s570_s15, 4  ;;  %s5193_s14 = sshll.u32 %s5283_s26, 4  ;;  %s5842_s17 = int_to_ptr.vmem [resolvable:$true] %s4036_s17  ;;  %s5194_s14 = int_to_ptr.vmem [resolvable:$false] %s5193_s14 }
 0x51e   : > { %s5189_s13 = scalar_lea.vmem %s5842_s17, 256  ;;  %s5195_s1 = scalar_lea.vmem %s5194_s14, 512 }
 0x51f   : > { %v1199_v38 = vpop.f32.mrb[16].mxu1  ;;  %p5190_p10 = scmp.ne.s32.totalorder %s5842_s17, %s5189_s13  ;;  %p5196_p12 = scmp.lt.s32.totalorder %s5842_s17, %s5194_s14 }
 0x520   : > { %v4729_v39 = vpop.f32.mrb[17].mxu1  ;;  %p5197_p2 = scmp.lt.s32.totalorder %s5195_s1, %s5189_s13 }
 0x521   : > { %v1202_v40 = vpop.f32.mrb[18].mxu1  ;;  %v4219_v39 = vcombine.low %v1376_v35, %v1378_v37  ;;  %p5191_p3 = pnand %p5190_p10, %p5531_p5 }
 0x522   : > { %v1206_v41 = vpack.c.bf16 %v1202_v40, %v1199_v38  ;;  %v4730_v42 = vpop.f32.mrb[19].mxu1  ;;  %v4217_v38 = vcombine.low %v1375_v32, %v1377_v34  ;;  %v4220_v40 = vcombine.high %v1376_v35, %v1378_v37  ;;  %v4203_v32 = vld [vmem:[%s5891_s5] ss:$0 sm:$0xff]  ;;  %p5198_p1 = por %p5197_p2, %p5196_p12 }
 0x523   : > { %v1381_v42 = vld [vmem:[#allocation8 + $0x240] sm:$0xff]  ;;  %v4204_v37 = vld [vmem:[%s5933_s16] ss:$0 sm:$0xff]  ;;  %s5936_s16 = sld [smem:[#allocation22_spill]]  ;;  %p5192_p7 = pneg %p5191_p3 }
 0x524   : > { %1211 = vrot.lane.b32.xlu1 %v1206_v41, %s5282_s25  ;;  %v1379_v41 = vld [vmem:[#allocation8 + $0x200] sm:$0xff] }
 0x525   : > { %p5199_p13 = pnand %p5198_p1, %p5192_p7 }
 0x58e   : > { %v1209_v43 = vpop.permute.xlu1 %1208 }
 0x58f   : > { %v1215_v44 = vsel %vm846_vm1, %v966_v27, %v1209_v43  ;;  %v4215_v27 = vcombine.low %v1372_v61, %v1374_v25  ;;  %v1380_v43 = vld [vmem:[#allocation8 + $0x208] sm:$0xff] }
 0x596   : > { %v1212_v46 = vpop.permute.xlu1 %1211 }
 0x597   : > { %v1218_v47 = vsel %vm1216_vm3, %v1215_v44, %v1212_v46  ;;  %v4222_v44 = vcombine.high %v1379_v41, %v1381_v42  ;;  %v1382_v46 = vld [vmem:[#allocation8 + $0x248] sm:$0xff] }
 0x598   : > { %4744 = vmatmul.mubr.msk.bf16.vlgmr.msra.gmra.mrb[12].mxu0 %vm1274_vm4, %v1218_v47  ;;  %v4221_v47 = vcombine.low %v1379_v41, %v1381_v42  ;;  %v1744_v41 = vld [vmem:[#allocation8 + $0x98] sm:$0xff] }
 0x599   : > { %1652 = vmatprep.mubr.bf16.mxu0 %v5277_v0  ;;  %1621 = vmatpush1.bf16.msra.mxu0 %v4207_v6  ;;  %v4232_v6 = vcombine.high %v1388_v1, %v1390_v3  ;;  %v1746_v42 = vld [vmem:[#allocation8 + $0xd8] sm:$0xff] }
 0x59a   : > { %1622 = vmatprep.subr.bf16.mxu0 %v4212_v10  ;;  %v1394_v10 = vld [vmem:[#allocation8 + $0x3c8] sm:$0xff] }
 0x66b   : > { %v1311_v50 = vpop.f32.mrb[12].mxu0 }
 0x66c   : > { %v1312_v51 = vadd.f32 %v4195_v49, %v1311_v50  ;;  %v4745_v52 = vpop.f32.mrb[13].mxu0  ;;  %v4224_v50 = vcombine.high %v1380_v43, %v1382_v46 }
 0x66d   : > { %v1314_v53 = vpop.f32.mrb[14].mxu0  ;;  %v1385_v52 = vld [vmem:[#allocation8 + $0x2c0] sm:$0xff] }
 0x66e   : > { %v1315_v54 = vadd.f32 %v4195_v49, %v1314_v53  ;;  %v4746_v56 = vpop.f32.mrb[15].mxu0  ;;  %v1318_v57 = vadd.f32 %v1312_v51, %v5601_v17  ;;  %v4209_v17 = vcombine.low %v1367_v4, %v1369_v5  ;;  %v4223_v49 = vcombine.low %v1380_v43, %v1382_v46  ;;  %v1383_v51 = vld [vmem:[#allocation8 + $0x280] sm:$0xff]  ;;  %v1384_v53 = vld [vmem:[#allocation8 + $0x288] sm:$0xff] }
 0x66f   : > { %v1386_v56 = vld [vmem:[#allocation8 + $0x2c8] sm:$0xff]  ;;  %v4229_v4 = vcombine.low %v1387_v62, %v1389_v63  ;;  %v4231_v5 = vcombine.low %v1388_v1, %v1390_v3  ;;  %v1754_v62 = vld [vmem:[#allocation8 + $0x1d8] sm:$0xff] }
 0x670   : > { %1322 = vadd.xlane.f32.xlu0 %v1318_v57  ;;  %v1319_v59 = vadd.f32 %v1315_v54, %v5604_v18  ;;  %v4211_v18 = vcombine.low %v1368_v8, %v1370_v9  ;;  %1580 = vmatpush1.bf16.msra.mxu1 %v4209_v17  ;;  %v4226_v54 = vcombine.high %v1383_v51, %v1385_v52  ;;  %v1392_v8 = vld [vmem:[#allocation8 + $0x388] sm:$0xff] }
 0x671   : > { %1581 = vmatprep.subr.bf16.mxu1 %v4214_v24  ;;  %v4228_v60 = vcombine.high %v1384_v53, %v1386_v56  ;;  %v4234_v9 = vcombine.high %v1391_v45, %v1393_v7  ;;  %v4233_v17 = vcombine.low %v1391_v45, %v1393_v7  ;;  %v4236_v11 = vcombine.high %v1392_v8, %v1394_v10  ;;  %v1758_v45 = vld [vmem:[#allocation8 + $0x258] sm:$0xff] }
 0x672   : > { %1324 = vadd.xlane.f32.xlu1 %v1319_v59  ;;  %1623 = vmatpush1.bf16.msra.mxu0 %v4211_v18  ;;  %v4235_v18 = vcombine.low %v1392_v8, %v1394_v10 }
 0x673   : > { %1624 = vmatprep.subr.bf16.mxu0 %v4216_v28 }
 0x674   : > { %1582 = vmatpush1.bf16.msra.mxu1 %v4213_v26 }
 0x675   : > { %1583 = vmatprep.subr.bf16.mxu1 %v4218_v36 }
 0x676   : > { %1625 = vmatpush1.bf16.msra.mxu0 %v4215_v27 }
 0x677   : > { %1626 = vmatprep.subr.bf16.mxu0 %v4220_v40  ;;  %v1745_v40 = vld [vmem:[#allocation8 + $0xd0] sm:$0xff] }
 0x678   : > { %1584 = vmatpush1.bf16.msra.mxu1 %v4217_v38 }
 0x679   : > { %1585 = vmatprep.subr.bf16.mxu1 %v4222_v44 }
 0x67a   : > { %1627 = vmatpush1.bf16.msra.mxu0 %v4219_v39  ;;  %v1743_v39 = vld [vmem:[#allocation8 + $0x90] sm:$0xff] }
 0x67b   : > { %1628 = vmatprep.subr.bf16.mxu0 %v4224_v50  ;;  %v4242_v46 = vcombine.high %v1743_v39, %v1745_v40  ;;  %v1748_v50 = vld [vmem:[#allocation8 + $0x118] sm:$0xff] }
 0x67c   : > { %1586 = vmatpush1.bf16.msra.mxu1 %v4221_v47  ;;  %v4244_v47 = vcombine.high %v1744_v41, %v1746_v42 }
 0x67d   : > { %1587 = vmatprep.subr.bf16.mxu1 %v4226_v54 }
 0x67e   : > { %1629 = vmatpush1.bf16.msra.mxu0 %v4223_v49  ;;  %v1749_v49 = vld [vmem:[#allocation8 + $0x150] sm:$0xff] }
 0x67f   : > { %1630 = vmatprep.subr.bf16.mxu0 %v4228_v60  ;;  %v1752_v60 = vld [vmem:[#allocation8 + $0x198] sm:$0xff] }
 0x680   : > { %v4252_v3 = vcombine.high %v1752_v60, %v1754_v62  ;;  %v4251_v8 = vcombine.low %v1752_v60, %v1754_v62  ;;  %v4902_v60 = vld [vmem:[#allocation10 + $0x198] sm:$0xff]   ;;  %v4903_v62 = vld [vmem:[#allocation10 + $0x160] sm:$0xff]  }
 0x6fd   : > { %v1323_v12 = vpop.xlane.xlu0 %1322 }
 0x6fe   : > { %v1326_v13 = vmul.f32 0.010416667, %v1323_v12  ;;  %v1739_v12 = vld [vmem:[#allocation8 + $0x10] sm:$0xff] }
 0x6ff   : > { %v1325_v14 = vpop.xlane.xlu1 %1324 }
 0x700   : > { %v1328_v16 = vsub.f32 %v1318_v57, %v1326_v13  ;;  %v1327_v19 = vmul.f32 0.010416667, %v1325_v14  ;;  %v4225_v57 = vcombine.low %v1383_v51, %v1385_v52  ;;  %v1741_v13 = vld [vmem:[#allocation8 + $0x50] sm:$0xff]  ;;  %v1740_v14 = vld [vmem:[#allocation8 + $0x18] sm:$0xff]  ;;  %v4241_v52 = vcombine.low %v1743_v39, %v1745_v40  ;;  %v4887_v40 = vld [vmem:[#allocation10 + $0x140] sm:$0xff]  }
 0x701   : > { %v1750_v51 = vld [vmem:[#allocation8 + $0x158] sm:$0xff] }
 0x702   : > { %v1329_v21 = vsub.f32 %v1319_v59, %v1327_v19  ;;  %v5717_v22 = vmul.f32 %v5714_v15, %v1328_v16  ;;  %v4227_v59 = vcombine.low %v1384_v53, %v1386_v56  ;;  %1588 = vmatpush1.bf16.msra.mxu1 %v4225_v57  ;;  %v4237_v16 = vcombine.low %v1739_v12, %v1741_v13  ;;  %v1751_v57 = vld [vmem:[#allocation8 + $0x190] sm:$0xff] }
 0x703   : > { %1589 = vmatprep.subr.bf16.mxu1 %v4230_v2  ;;  %v4238_v19 = vcombine.high %v1739_v12, %v1741_v13  ;;  %v4243_v53 = vcombine.low %v1744_v41, %v1746_v42  ;;  %v4248_v56 = vcombine.high %v1748_v50, %v1750_v51  ;;  %v4247_v1 = vcombine.low %v1748_v50, %v1750_v51  ;;  %v1762_v12 = vld [vmem:[#allocation8 + $0x2d8] sm:$0xff]  ;;  %v4888_v41 = vld [vmem:[#allocation10 + $0x1c0] sm:$0xff]   ;;  %v4894_v50 = vld [vmem:[#allocation10 + $0x188] sm:$0xff]  }
 0x704   : > { %v1332_v23 = vmul.f32 %v5717_v22, %v5717_v22  ;;  %v5722_v55 = vmul.f32 %v5714_v15, %v1329_v21  ;;  %1631 = vmatpush1.bf16.msra.mxu0 %v4227_v59  ;;  %v1742_v21 = vld [vmem:[#allocation8 + $0x58] sm:$0xff]  ;;  %v1753_v59 = vld [vmem:[#allocation8 + $0x1d0] sm:$0xff]  ;;  %v4889_v42 = vld [vmem:[#allocation10 + $0x100] sm:$0xff]  }
 0x705   : > { %1632 = vmatprep.subr.bf16.mxu0 %v4232_v6  ;;  %v4250_v2 = vcombine.high %v1751_v57, %v1753_v59  ;;  %v1756_v6 = vld [vmem:[#allocation8 + $0x218] sm:$0xff]  ;;  %v4249_v7 = vcombine.low %v1751_v57, %v1753_v59  ;;  %v4895_v51 = vld [vmem:[#allocation10 + $0x150] sm:$0xff]  }
 0x706   : > { %1334 = vadd.xlane.f32.xlu0 %v1332_v23  ;;  %v1333_v29 = vmul.f32 %v5722_v55, %v5722_v55  ;;  %1590 = vmatpush1.bf16.msra.mxu1 %v4229_v4  ;;  %v4239_v23 = vcombine.low %v1740_v14, %v1742_v21  ;;  %v1755_v4 = vld [vmem:[#allocation8 + $0x210] sm:$0xff]  ;;  %v4256_v10 = vcombine.high %v1756_v6, %v1758_v45  ;;  %v4900_v57 = vld [vmem:[#allocation10 + $0x1d8] sm:$0xff]  }
 0x707   : > { %1591 = vmatprep.subr.bf16.mxu1 %v4234_v9  ;;  %v4901_v59 = vld [vmem:[#allocation10 + $0x118] sm:$0xff]  }
 0x708   : > { %1633 = vmatpush1.bf16.msra.mxu0 %v4231_v5  ;;  %v1757_v5 = vld [vmem:[#allocation8 + $0x250] sm:$0xff] }
 0x709   : > { %1634 = vmatprep.subr.bf16.mxu0 %v4236_v11  ;;  %v4254_v9 = vcombine.high %v1755_v4, %v1757_v5  ;;  %v1760_v11 = vld [vmem:[#allocation8 + $0x298] sm:$0xff]  ;;  %v4253_v13 = vcombine.low %v1755_v4, %v1757_v5  ;;  %v4908_v4 = vld [vmem:[#allocation10 + $0x1e8] sm:$0xff]  }
 0x70a   : > { %1336 = vadd.xlane.f32.xlu0 %v1333_v29  ;;  %1592 = vmatpush1.bf16.msra.mxu1 %v4233_v17  ;;  %v4240_v29 = vcombine.high %v1740_v14, %v1742_v21  ;;  %v1759_v17 = vld [vmem:[#allocation8 + $0x290] sm:$0xff]  ;;  %v4255_v14 = vcombine.low %v1756_v6, %v1758_v45  ;;  %v4909_v5 = vld [vmem:[#allocation10 + $0x128] sm:$0xff]  }
 0x70b   : > { %1953 = vmatprep.subr.bf16.mxu1 %v4238_v19  ;;  %v4260_v19 = vcombine.high %v1760_v11, %v1762_v12  ;;  %v1763_v21 = vld [vmem:[#allocation8 + $0x310] sm:$0xff]  ;;  %v4910_v6 = vld [vmem:[#allocation10 + $0x1a8] sm:$0xff]  }
 0x70c   : > { %1635 = vmatpush1.bf16.msra.mxu0 %v4235_v18  ;;  %v1761_v18 = vld [vmem:[#allocation8 + $0x2d0] sm:$0xff] }
 0x70d   : > { %1996 = vmatprep.subr.bf16.mxu0 %v4240_v29  ;;  %v1764_v29 = vld [vmem:[#allocation8 + $0x318] sm:$0xff]  ;;  %v4911_v45 = vld [vmem:[#allocation10 + $0x170] sm:$0xff]  }
 0x793   : > { %v1335_v58 = vpop.xlane.xlu0 %1334 }
 0x794   : > { %v1338_v20 = vmul.f32 0.010416667, %v1335_v58  ;;  %v1766_v58 = vld [vmem:[#allocation8 + $0x358] sm:$0xff] }
 0x796   : > { %v1340_v61 = vadd.f32 1e-05, %v1338_v20  ;;  %v4257_v20 = vcombine.low %v1759_v17, %v1761_v18 }
 0x797   : > { %v1337_v24 = vpop.xlane.xlu0 %1336 }
 0x798   : > { %5039 = vrsqrt.f32 %v1340_v61  ;;  %v1339_v25 = vmul.f32 0.010416667, %v1337_v24  ;;  %v4259_v61 = vcombine.low %v1760_v11, %v1762_v12  ;;  %v4918_v11 = vld [vmem:[#allocation10 + $0x1b8] sm:$0xff]   ;;  %v4919_v12 = vld [vmem:[#allocation10 + $0x40] sm:$0xff]  }
 0x79a   : > { %v1341_v26 = vadd.f32 1e-05, %v1339_v25  ;;  %v4264_v25 = vcombine.high %v1764_v29, %v1766_v58 }
 0x79c   : > { %5041 = vrsqrt.f32 %v1341_v26  ;;  %v1767_v26 = vld [vmem:[#allocation8 + $0x390] sm:$0xff] }
 0x7a2   : > { %v5040_v27 = vpop.eup %5039 }
 0x7a3   : > { %v1344_v28 = vmul.f32 %v5040_v27, %v5717_v22  ;;  %v1769_v27 = vld [vmem:[#allocation8 + $0x3d0] sm:$0xff] }
 0x7a5   : > { %v1352_v35 = vmul.f32 %v4203_v32, %v1344_v28  ;;  %v1768_v28 = vld [vmem:[#allocation8 + $0x398] sm:$0xff] }
 0x7a6   : > { %v5042_v34 = vpop.eup %5041 }
 0x7a7   : > { %v1345_v36 = vmul.f32 %v5042_v34, %v5722_v55  ;;  %v5734_v43 = vadd.f32 %v4204_v37, %v1352_v35  ;;  %v1747_v55 = vld [vmem:[#allocation8 + $0x110] sm:$0xff]  ;;  %v4263_v35 = vcombine.low %v1764_v29, %v1766_v58 }
 0x7a8   : > { %v4246_v54 = vcombine.high %v1747_v55, %v1749_v49  ;;  %v4245_v63 = vcombine.low %v1747_v55, %v1749_v49  ;;  %v4892_v55 = vld [vmem:[#allocation10 + $0x1c8] sm:$0xff]  }
 0x7a9   : > { %v1353_v38 = vmul.f32 %v4203_v32, %v1345_v36  ;;  %v1770_v32 = vld [vmem:[#allocation8 + $0x3d8] sm:$0xff]  ;;  %v4266_v36 = vcombine.high %v1767_v26, %v1769_v27  ;;  %v4893_v49 = vld [vmem:[#allocation10 + $0x108] sm:$0xff]  }
 0x7aa   : > { %v4267_v39 = vcombine.low %v1768_v28, %v1770_v32 }
 0x7ab   : > { %v5736_v22 = vadd.f32 %v4204_v37, %v1353_v38  ;;  %v4268_v37 = vcombine.high %v1768_v28, %v1770_v32  ;;  %v4265_v38 = vcombine.low %v1767_v26, %v1769_v27 }
 0x7ad   : > { %v5740_v44 = vpack.c.bf16 %v5736_v22, %v5734_v43 }
 0x7af   : > { %1610 = vmatmul.mubr.bf16.vlgmr.msra.gmra.mrb[20].mxu1 %v5740_v44  ;;  %1653 = vmatmul.mubr.bf16.vlgmr.msra.gmra.mrb[16].mxu0 %v5740_v44 }
 0x7b0   : > { %1954 = vmatpush1.bf16.msra.mxu1 %v4237_v16  ;;  %1997 = vmatpush1.bf16.msra.mxu0 %v4239_v23  ;;  %v4258_v16 = vcombine.high %v1759_v17, %v1761_v18  ;;  %v1765_v23 = vld [vmem:[#allocation8 + $0x350] sm:$0xff]  ;;  %v4916_v17 = vld [vmem:[#allocation10 + $0x1f8] sm:$0xff]  }
 0x7b1   : > { %1955 = vmatprep.subr.bf16.mxu1 %v4242_v46  ;;  %1998 = vmatprep.subr.bf16.mxu0 %v4244_v47  ;;  %v4262_v24 = vcombine.high %v1763_v21, %v1765_v23  ;;  %v4261_v34 = vcombine.low %v1763_v21, %v1765_v23  ;;  %v4890_v46 = vld [vmem:[#allocation10 + $0x180] sm:$0xff]   ;;  %v4891_v47 = vld [vmem:[#allocation10 + $0x148] sm:$0xff]   ;;  %v4917_v18 = vld [vmem:[#allocation10 + $0x138] sm:$0xff]  }
 0x7b2   : > { %1985 = vmatprep.mubr.bf16.mxu1 %v5277_v0  ;;  %2028 = vmatprep.mubr.bf16.mxu0 %v5277_v0 }
 0x7b4   : > { %1956 = vmatpush1.bf16.msra.mxu1 %v4241_v52  ;;  %1999 = vmatpush1.bf16.msra.mxu0 %v4243_v53  ;;  %v4896_v52 = vld [vmem:[#allocation10 + $0x1d0] sm:$0xff]  }
 0x7b5   : > { %1957 = vmatprep.subr.bf16.mxu1 %v4246_v54  ;;  %2000 = vmatprep.subr.bf16.mxu0 %v4248_v56  ;;  %v4897_v53 = vld [vmem:[#allocation10 + $0x110] sm:$0xff]   ;;  %v4899_v56 = vld [vmem:[#allocation10 + $0x158] sm:$0xff]  }
 0x7b6   : > { %v4898_v54 = vld [vmem:[#allocation10 + $0x190] sm:$0xff]  }
 0x7b8   : > { %1958 = vmatpush1.bf16.msra.mxu1 %v4245_v63  ;;  %2001 = vmatpush1.bf16.msra.mxu0 %v4247_v1  ;;  %v4904_v63 = vld [vmem:[#allocation10 + $0x1e0] sm:$0xff]  }
 0x7b9   : > { %1959 = vmatprep.subr.bf16.mxu1 %v4250_v2  ;;  %2002 = vmatprep.subr.bf16.mxu0 %v4252_v3  ;;  %v4905_v1 = vld [vmem:[#allocation10 + $0x120] sm:$0xff]   ;;  %v4907_v3 = vld [vmem:[#allocation10 + $0x168] sm:$0xff]  }
 0x7ba   : > { %v4906_v2 = vld [vmem:[#allocation10 + $0x1a0] sm:$0xff]  }
 0x7bc   : > { %1960 = vmatpush1.bf16.msra.mxu1 %v4249_v7  ;;  %2003 = vmatpush1.bf16.msra.mxu0 %v4251_v8  ;;  %v4912_v7 = vld [vmem:[#allocation10 + $0x1f0] sm:$0xff]  }
 0x7bd   : > { %1961 = vmatprep.subr.bf16.mxu1 %v4254_v9  ;;  %2004 = vmatprep.subr.bf16.mxu0 %v4256_v10  ;;  %v4913_v8 = vld [vmem:[#allocation10 + $0x130] sm:$0xff]   ;;  %v4915_v10 = vld [vmem:[#allocation10 + $0x178] sm:$0xff]  }
 0x7be   : > { %v4914_v9 = vld [vmem:[#allocation10 + $0x1b0] sm:$0xff]  }
 0x7c0   : > { %1962 = vmatpush1.bf16.msra.mxu1 %v4253_v13  ;;  %2005 = vmatpush1.bf16.msra.mxu0 %v4255_v14  ;;  %v4920_v13 = vld [vmem:[#allocation10 + $0xc0] sm:$0xff]   ;;  %v1395_v14 = vld [vmem:[%s5934_s29] sm:$0xf] }
 0x7c1   : > { %1963 = vmatprep.subr.bf16.mxu1 %v4258_v16  ;;  %2006 = vmatprep.subr.bf16.mxu0 %v4260_v19  ;;  %v5752_v16 = vsub.s32 3, %v5625_v30  ;;  %v1400_v19 = vrot.slane %v1395_v14, %v5628_v31  ;;  %v1408_v21 = vrot.slane %v1395_v14, %v5647_v48  ;;  %v1404_v23 = vrot.slane %v1395_v14, %v5634_v33 }
 0x7c3   : > { %v1412_v29 = vrot.slane %v1395_v14, %v5752_v16 }
 0x7c4   : > { %1964 = vmatpush1.bf16.msra.mxu1 %v4257_v20  ;;  %2007 = vmatpush1.bf16.msra.mxu0 %v4259_v61 }
 0x7c5   : > { %1965 = vmatprep.subr.bf16.mxu1 %v4262_v24  ;;  %2008 = vmatprep.subr.bf16.mxu0 %v4264_v25 }
 0x7c8   : > { %1966 = vmatpush1.bf16.msra.mxu1 %v4261_v34  ;;  %2009 = vmatpush1.bf16.msra.mxu0 %v4263_v35 }
 0x7c9   : > { %1967 = vmatprep.subr.bf16.mxu1 %v4266_v36  ;;  %2010 = vmatprep.subr.bf16.mxu0 %v4268_v37 }
 0x7cc   : > { %1968 = vmatpush1.bf16.msra.mxu1 %v4265_v38  ;;  %2011 = vmatpush1.bf16.msra.mxu0 %v4267_v39 }
 0x7cd   : > { %4499 = vmatprep.subr.bf16.mxu1 %v4887_v40  ;;  %4521 = vmatprep.subr.bf16.mxu0 %v4888_v41 }
 0x7cf   : > { %1986 = vmatmul.mubr.bf16.vlgmr.msra.gmra.mrb[24].mxu1 %v5740_v44  ;;  %2029 = vmatmul.mubr.bf16.vlgmr.msra.gmra.mrb[20].mxu0 %v5740_v44 }
 0x7d0   : > { %4500 = vmatpush3.bf16.msra.mxu1 %v4889_v42  ;;  %4522 = vmatpush3.bf16.msra.mxu0 %v4890_v46 }
 0x7d1   : > { %4501 = vmatprep.subr.bf16.mxu1 %v4891_v47  ;;  %4523 = vmatprep.subr.bf16.mxu0 %v4892_v55 }
 0x7d4   : > { %4502 = vmatpush3.bf16.msra.mxu1 %v4893_v49  ;;  %4524 = vmatpush3.bf16.msra.mxu0 %v4894_v50 }
 0x7d5   : > { %4503 = vmatprep.subr.bf16.mxu1 %v4895_v51  ;;  %4525 = vmatprep.subr.bf16.mxu0 %v4896_v52 }
 0x7d8   : > { %4504 = vmatpush3.bf16.msra.mxu1 %v4897_v53  ;;  %4526 = vmatpush3.bf16.msra.mxu0 %v4898_v54 }
 0x7d9   : > { %4505 = vmatprep.subr.bf16.mxu1 %v4899_v56  ;;  %4527 = vmatprep.subr.bf16.mxu0 %v4900_v57  ;;  %v1771_v56 = vld [vmem:[%s5934_s29 + $0x4] sm:$0xf] }
 0x7da   : > { %v1776_v57 = vrot.slane %v1771_v56, %v5628_v31 }
 0x7dc   : > { %4506 = vmatpush3.bf16.msra.mxu1 %v4901_v59  ;;  %4528 = vmatpush3.bf16.msra.mxu0 %v4902_v60  ;;  %v1784_v59 = vrot.slane %v1771_v56, %v5647_v48  ;;  %v1780_v60 = vrot.slane %v1771_v56, %v5634_v33 }
 0x7dd   : > { %4507 = vmatprep.subr.bf16.mxu1 %v4903_v62  ;;  %4529 = vmatprep.subr.bf16.mxu0 %v4904_v63  ;;  %v1788_v62 = vrot.slane %v1771_v56, %v5752_v16  ;;  %v4941_v56 = vld [vmem:[#allocation10 + $0x28] sm:$0xff]  }
 0x7e0   : > { %4508 = vmatpush3.bf16.msra.mxu1 %v4905_v1  ;;  %4530 = vmatpush3.bf16.msra.mxu0 %v4906_v2 }
 0x7e1   : > { %4509 = vmatprep.subr.bf16.mxu1 %v4907_v3  ;;  %4531 = vmatprep.subr.bf16.mxu0 %v4908_v4 }
 0x7e4   : > { %4510 = vmatpush3.bf16.msra.mxu1 %v4909_v5  ;;  %4532 = vmatpush3.bf16.msra.mxu0 %v4910_v6 }
 0x7e5   : > { %4511 = vmatprep.subr.bf16.mxu1 %v4911_v45  ;;  %4533 = vmatprep.subr.bf16.mxu0 %v4912_v7 }
 0x7e8   : > { %4512 = vmatpush3.bf16.msra.mxu1 %v4913_v8  ;;  %4534 = vmatpush3.bf16.msra.mxu0 %v4914_v9 }
 0x7e9   : > { %4513 = vmatprep.subr.bf16.mxu1 %v4915_v10  ;;  %4535 = vmatprep.subr.bf16.mxu0 %v4916_v17 }
 0x7ec   : > { %4514 = vmatpush3.bf16.msra.mxu1 %v4917_v18  ;;  %4536 = vmatpush3.bf16.msra.mxu0 %v4918_v11 }
 0x7ed   : > { %4543 = vmatprep.subr.bf16.mxu1 %v4919_v12  ;;  %4565 = vmatprep.subr.bf16.mxu0 %v4920_v13 }
 0x882   : > { %v1611_v58 = vpop.f32.mrb[20].mxu1  ;;  %v1654_v20 = vpop.f32.mrb[16].mxu0 }
 0x883   : > { %v1612_v61 = vadd.f32 %v1611_v58, %v1400_v19  ;;  %v1655_v24 = vadd.f32 %v1654_v20, %v1408_v21  ;;  %v1613_v25 = vpop.f32.mrb[21].mxu1  ;;  %v1656_v26 = vpop.f32.mrb[17].mxu0 }
 0x884   : > { %v1614_v27 = vadd.f32 %v1613_v25, %v1404_v23  ;;  %v1657_v28 = vadd.f32 %v1656_v26, %v1412_v29  ;;  %v1615_v32 = vpop.f32.mrb[22].mxu1  ;;  %v1658_v34 = vpop.f32.mrb[18].mxu0 }
 0x885   : > { %v1616_v30 = vadd.f32 %v1615_v32, %v1400_v19  ;;  %v1659_v35 = vadd.f32 %v1658_v34, %v1408_v21  ;;  %v1617_v36 = vpop.f32.mrb[23].mxu1  ;;  %v1660_v37 = vpop.f32.mrb[19].mxu0  ;;  %v1663_v40 = vmax.f32 %v1612_v61, 0.0  ;;  %v1665_v41 = vmax.f32 %v1655_v24, 0.0  ;;  %v4923_v32 = vld [vmem:[#allocation10 + $0x48] sm:$0xff]  }
 0x886   : > { %v1618_v38 = vadd.f32 %v1617_v36, %v1404_v23  ;;  %v1661_v39 = vadd.f32 %v1660_v37, %v1412_v29  ;;  %v1664_v47 = vmax.f32 %v1614_v27, 0.0  ;;  %v1666_v55 = vmax.f32 %v1657_v28, 0.0  ;;  %v4921_v27 = vld [vmem:[#allocation10] sm:$0xff]   ;;  %v4924_v34 = vld [vmem:[#allocation10 + $0xc8] sm:$0xff]   ;;  %v4927_v36 = vld [vmem:[#allocation10 + $0x50] sm:$0xff]  }
 0x887   : > { %v1667_v42 = vmax.f32 %v1616_v30, 0.0  ;;  %v1669_v46 = vmax.f32 %v1659_v35, 0.0  ;;  %v4922_v28 = vld [vmem:[#allocation10 + $0x80] sm:$0xff]   ;;  %v4925_v30 = vld [vmem:[#allocation10 + $0x8] sm:$0xff]   ;;  %v4928_v37 = vld [vmem:[#allocation10 + $0xd0] sm:$0xff]  }
 0x888   : > { %v1668_v49 = vmax.f32 %v1618_v38, 0.0  ;;  %v1670_v50 = vmax.f32 %v1661_v39, 0.0  ;;  %v4926_v35 = vld [vmem:[#allocation10 + $0x88] sm:$0xff]   ;;  %v4929_v38 = vld [vmem:[#allocation10 + $0x10] sm:$0xff]  }
 0x889   : > { %v5758_v51 = vpack.c.bf16 %v1667_v42, %v1663_v40  ;;  %v5760_v52 = vpack.c.bf16 %v1669_v46, %v1665_v41  ;;  %v4930_v39 = vld [vmem:[#allocation10 + $0x90] sm:$0xff]   ;;  %v4931_v40 = vld [vmem:[#allocation10 + $0x58] sm:$0xff]  }
 0x88a   : > { %v1672_v53 = vpack.c.bf16 %v1668_v49, %v1664_v47  ;;  %v1674_v54 = vpack.c.bf16 %v1670_v50, %v1666_v55  ;;  %v4932_v41 = vld [vmem:[#allocation10 + $0xd8] sm:$0xff]   ;;  %v4935_v47 = vld [vmem:[#allocation10 + $0x60] sm:$0xff]  }
 0x88b   : > { %v4933_v42 = vld [vmem:[#allocation10 + $0x18] sm:$0xff]   ;;  %v4936_v55 = vld [vmem:[#allocation10 + $0xe0] sm:$0xff]  }
 0x88c   : > { %v4934_v46 = vld [vmem:[#allocation10 + $0x98] sm:$0xff]   ;;  %v4937_v49 = vld [vmem:[#allocation10 + $0x20] sm:$0xff]  }
 0x88d   : > { %v4938_v50 = vld [vmem:[#allocation10 + $0xa0] sm:$0xff]  }
 0x8a2   : > { %v1987_v63 = vpop.f32.mrb[24].mxu1  ;;  %v2030_v1 = vpop.f32.mrb[20].mxu0 }
 0x8a3   : > { %v1988_v2 = vadd.f32 %v1987_v63, %v1776_v57  ;;  %v2031_v3 = vadd.f32 %v2030_v1, %v1784_v59  ;;  %v1989_v4 = vpop.f32.mrb[25].mxu1  ;;  %v2032_v5 = vpop.f32.mrb[21].mxu0  ;;  %v4946_v63 = vld [vmem:[#allocation10 + $0xb0] sm:$0xff]   ;;  %v4947_v1 = vld [vmem:[#allocation10 + $0x78] sm:$0xff]  }
 0x8a4   : > { %v1990_v6 = vadd.f32 %v1989_v4, %v1780_v60  ;;  %v2033_v45 = vadd.f32 %v2032_v5, %v1788_v62  ;;  %v1991_v7 = vpop.f32.mrb[26].mxu1  ;;  %v2034_v8 = vpop.f32.mrb[22].mxu0  ;;  %v2665_v4 = vld [vmem:[#allocation8 + $0x60] sm:$0xff]  ;;  %v2664_v5 = vld [vmem:[#allocation8 + $0x28] sm:$0xff] }
 0x8a5   : > { %v1992_v9 = vadd.f32 %v1991_v7, %v1776_v57  ;;  %v2035_v10 = vadd.f32 %v2034_v8, %v1784_v59  ;;  %v1993_v17 = vpop.f32.mrb[27].mxu1  ;;  %v2036_v18 = vpop.f32.mrb[23].mxu0  ;;  %v2039_v13 = vmax.f32 %v1988_v2, 0.0  ;;  %v2041_v14 = vmax.f32 %v2031_v3, 0.0  ;;  %v4942_v57 = vld [vmem:[#allocation10 + $0xa8] sm:$0xff]   ;;  %v4943_v59 = vld [vmem:[#allocation10 + $0x70] sm:$0xff]  }
 0x8a6   : > { %v1994_v11 = vadd.f32 %v1993_v17, %v1780_v60  ;;  %v2037_v12 = vadd.f32 %v2036_v18, %v1788_v62  ;;  %v2040_v23 = vmax.f32 %v1990_v6, 0.0  ;;  %v2042_v29 = vmax.f32 %v2033_v45, 0.0  ;;  %v4944_v60 = vld [vmem:[#allocation10 + $0xf0] sm:$0xff]   ;;  %v4948_v2 = vld [vmem:[#allocation10 + $0xf8] sm:$0xff]   ;;  %v2663_v3 = vld [vmem:[#allocation8 + $0x20] sm:$0xff] }
 0x8a7   : > { %v2043_v19 = vmax.f32 %v1992_v9, 0.0  ;;  %v2045_v21 = vmax.f32 %v2035_v10, 0.0  ;;  %v4945_v62 = vld [vmem:[#allocation10 + $0x30] sm:$0xff]   ;;  %v2666_v6 = vld [vmem:[#allocation8 + $0x68] sm:$0xff]  ;;  %v4949_v45 = vld [vmem:[#allocation10 + $0x38] sm:$0xff]   ;;  %v4334_v8 = vcombine.high %v2663_v3, %v2665_v4 }
 0x8a8   : > { %v2044_v58 = vmax.f32 %v1994_v11, 0.0  ;;  %v2046_v20 = vmax.f32 %v2037_v12, 0.0  ;;  %v4950_v7 = vld [vmem:[#allocation10 + $0xb8] sm:$0xff]   ;;  %v4336_v9 = vcombine.high %v2664_v5, %v2666_v6  ;;  %v2667_v10 = vld [vmem:[#allocation8 + $0xa0] sm:$0xff]  ;;  %v2668_v18 = vld [vmem:[#allocation8 + $0xa8] sm:$0xff]  ;;  %v4333_v12 = vcombine.low %v2663_v3, %v2665_v4 }
 0x8a9   : > { %v2047_v61 = vpack.c.bf16 %v2043_v19, %v2039_v13  ;;  %v2049_v24 = vpack.c.bf16 %v2045_v21, %v2041_v14  ;;  %v2669_v17 = vld [vmem:[#allocation8 + $0xe0] sm:$0xff]  ;;  %v2670_v11 = vld [vmem:[#allocation8 + $0xe8] sm:$0xff]  ;;  %v4335_v13 = vcombine.low %v2664_v5, %v2666_v6 }
 0x8aa   : > { %v2048_v25 = vpack.c.bf16 %v2044_v58, %v2040_v23  ;;  %v2050_v26 = vpack.c.bf16 %v2046_v20, %v2042_v29  ;;  %v4338_v14 = vcombine.high %v2667_v10, %v2669_v17  ;;  %v4340_v19 = vcombine.high %v2668_v18, %v2670_v11  ;;  %v2671_v21 = vld [vmem:[#allocation8 + $0x120] sm:$0xff]  ;;  %v2672_v29 = vld [vmem:[#allocation8 + $0x128] sm:$0xff] }
 0x8ab   : > { %v2673_v23 = vld [vmem:[#allocation8 + $0x160] sm:$0xff]  ;;  %v2674_v58 = vld [vmem:[#allocation8 + $0x168] sm:$0xff]  ;;  %v4337_v20 = vcombine.low %v2667_v10, %v2669_v17 }
 0x8ac   : > { %2339 = vmatprep.mubr.bf16.mxu1 %v2048_v25  ;;  %2380 = vmatprep.mubr.bf16.mxu0 %v2050_v26  ;;  %v4344_v25 = vcombine.high %v2672_v29, %v2674_v58  ;;  %v2675_v26 = vld [vmem:[#allocation8 + $0x1a0] sm:$0xff]  ;;  %v2692_v6 = vld [vmem:[#allocation8 + $0x3a8] sm:$0xff] }
 0x8ad   : > { %2340 = vmatmul.mubr.bf16.vlgmr.msra.gmra.mrb[28].mxu1 %v2047_v61  ;;  %2381 = vmatmul.mubr.bf16.vlgmr.msra.gmra.mrb[24].mxu0 %v2049_v24  ;;  %v4339_v61 = vcombine.low %v2668_v18, %v2670_v11  ;;  %v4342_v24 = vcombine.high %v2671_v21, %v2673_v23  ;;  %v2691_v4 = vld [vmem:[#allocation8 + $0x3a0] sm:$0xff] }
 0x8ae   : > { %4544 = vmatpush3.bf16.msra.mxu1 %v4921_v27  ;;  %4566 = vmatpush3.bf16.msra.mxu0 %v4922_v28  ;;  %v2677_v27 = vld [vmem:[#allocation8 + $0x1e0] sm:$0xff]  ;;  %v2676_v28 = vld [vmem:[#allocation8 + $0x1a8] sm:$0xff] }
 0x8af   : > { %2613 = vmatprep.mubr.bf16.mxu1 %v1672_v53  ;;  %2654 = vmatprep.mubr.bf16.mxu0 %v1674_v54  ;;  %v4939_v53 = vld [vmem:[#allocation10 + $0x68] sm:$0xff]   ;;  %v2693_v5 = vld [vmem:[#allocation8 + $0x3e0] sm:$0xff] }
 0x8b0   : > { %4545 = vmatprep.subr.bf16.mxu1 %v4923_v32  ;;  %4567 = vmatprep.subr.bf16.mxu0 %v4924_v34  ;;  %v4940_v54 = vld [vmem:[#allocation10 + $0xe8] sm:$0xff]   ;;  %v4346_v34 = vcombine.high %v2675_v26, %v2677_v27  ;;  %v4361_v17 = vcombine.low %v2691_v4, %v2693_v5  ;;  %v4951_v11 = vld [vmem:[#allocation10 + $0x240] sm:$0xff]  }
 0x8b1   : > { %v2678_v32 = vld [vmem:[#allocation8 + $0x1e8] sm:$0xff] }
 0x8b2   : > { %4546 = vmatpush3.bf16.msra.mxu1 %v4925_v30  ;;  %4568 = vmatpush3.bf16.msra.mxu0 %v4926_v35  ;;  %v4348_v30 = vcombine.high %v2676_v28, %v2678_v32  ;;  %v2679_v35 = vld [vmem:[#allocation8 + $0x220] sm:$0xff] }
 0x8b3   : > { %4547 = vmatprep.subr.bf16.mxu1 %v4927_v36  ;;  %4569 = vmatprep.subr.bf16.mxu0 %v4928_v37  ;;  %v2681_v36 = vld [vmem:[#allocation8 + $0x260] sm:$0xff]  ;;  %v2680_v37 = vld [vmem:[#allocation8 + $0x228] sm:$0xff] }
 0x8b6   : > { %4548 = vmatpush3.bf16.msra.mxu1 %v4929_v38  ;;  %4570 = vmatpush3.bf16.msra.mxu0 %v4930_v39  ;;  %v2682_v38 = vld [vmem:[#allocation8 + $0x268] sm:$0xff]  ;;  %v4345_v39 = vcombine.low %v2675_v26, %v2677_v27  ;;  %v4964_v26 = vld [vmem:[#allocation10 + $0x2d8] sm:$0xff]  }
 0x8b7   : > { %4549 = vmatprep.subr.bf16.mxu1 %v4931_v40  ;;  %4571 = vmatprep.subr.bf16.mxu0 %v4932_v41  ;;  %v4347_v40 = vcombine.low %v2676_v28, %v2678_v32  ;;  %v4350_v41 = vcombine.high %v2679_v35, %v2681_v36  ;;  %v4965_v27 = vld [vmem:[#allocation10 + $0x218] sm:$0xff]   ;;  %v4967_v32 = vld [vmem:[#allocation10 + $0x260] sm:$0xff]  }
 0x8b8   : > { %v4966_v28 = vld [vmem:[#allocation10 + $0x298] sm:$0xff]  }
 0x8ba   : > { %4550 = vmatpush3.bf16.msra.mxu1 %v4933_v42  ;;  %4572 = vmatpush3.bf16.msra.mxu0 %v4934_v46  ;;  %v4352_v42 = vcombine.high %v2680_v37, %v2682_v38  ;;  %v2683_v46 = vld [vmem:[#allocation8 + $0x2a0] sm:$0xff] }
 0x8bb   : > { %4551 = vmatprep.subr.bf16.mxu1 %v4935_v47  ;;  %4573 = vmatprep.subr.bf16.mxu0 %v4936_v55  ;;  %v2685_v47 = vld [vmem:[#allocation8 + $0x2e0] sm:$0xff]  ;;  %v2684_v55 = vld [vmem:[#allocation8 + $0x2a8] sm:$0xff] }
 0x8be   : > { %4552 = vmatpush3.bf16.msra.mxu1 %v4937_v49  ;;  %4574 = vmatpush3.bf16.msra.mxu0 %v4938_v50  ;;  %v2686_v49 = vld [vmem:[#allocation8 + $0x2e8] sm:$0xff]  ;;  %v4349_v50 = vcombine.low %v2679_v35, %v2681_v36 }
 0x8bf   : > { %4553 = vmatprep.subr.bf16.mxu1 %v4939_v53  ;;  %4575 = vmatprep.subr.bf16.mxu0 %v4940_v54  ;;  %v4351_v53 = vcombine.low %v2680_v37, %v2682_v38  ;;  %v4354_v54 = vcombine.high %v2683_v46, %v2685_v47  ;;  %v4972_v35 = vld [vmem:[#allocation10 + $0x2e8] sm:$0xff]   ;;  %v4975_v38 = vld [vmem:[#allocation10 + $0x270] sm:$0xff]  }
 0x8c0   : > { %v4973_v36 = vld [vmem:[#allocation10 + $0x228] sm:$0xff]  }
 0x8c1   : > { %v4974_v37 = vld [vmem:[#allocation10 + $0x2a8] sm:$0xff]  }
 0x8c2   : > { %4554 = vmatpush3.bf16.msra.mxu1 %v4941_v56  ;;  %4576 = vmatpush3.bf16.msra.mxu0 %v4942_v57  ;;  %v4356_v56 = vcombine.high %v2684_v55, %v2686_v49  ;;  %v2687_v57 = vld [vmem:[#allocation8 + $0x320] sm:$0xff] }
 0x8c3   : > { %4555 = vmatprep.subr.bf16.mxu1 %v4943_v59  ;;  %4577 = vmatprep.subr.bf16.mxu0 %v4944_v60  ;;  %v2689_v59 = vld [vmem:[#allocation8 + $0x360] sm:$0xff]  ;;  %v2688_v60 = vld [vmem:[#allocation8 + $0x328] sm:$0xff] }
 0x8c6   : > { %4556 = vmatpush3.bf16.msra.mxu1 %v4945_v62  ;;  %4578 = vmatpush3.bf16.msra.mxu0 %v4946_v63  ;;  %v2690_v62 = vld [vmem:[#allocation8 + $0x368] sm:$0xff]  ;;  %v4353_v63 = vcombine.low %v2683_v46, %v2685_v47  ;;  %v4980_v46 = vld [vmem:[#allocation10 + $0x2f8] sm:$0xff]  }
 0x8c7   : > { %4557 = vmatprep.subr.bf16.mxu1 %v4947_v1  ;;  %4579 = vmatprep.subr.bf16.mxu0 %v4948_v2  ;;  %v4355_v1 = vcombine.low %v2684_v55, %v2686_v49  ;;  %v4358_v2 = vcombine.high %v2687_v57, %v2689_v59  ;;  %v4360_v3 = vcombine.high %v2688_v60, %v2690_v62  ;;  %v4981_v47 = vld [vmem:[#allocation10 + $0x238] sm:$0xff]   ;;  %v5775_v49 = vld [vmem:[#allocation8 + $0x30] sm:$0xff] }
 0x8c8   : > { %v4982_v55 = vld [vmem:[#allocation10 + $0x2b8] sm:$0xff]  }
 0x8ca   : > { %4558 = vmatpush3.bf16.msra.mxu1 %v4949_v45  ;;  %4580 = vmatpush3.bf16.msra.mxu0 %v4950_v7  ;;  %v2694_v45 = vld [vmem:[#allocation8 + $0x3e8] sm:$0xff]  ;;  %v4357_v7 = vcombine.low %v2687_v57, %v2689_v59 }
 0x8cb   : > { %2877 = vmatprep.subr.bf16.mxu1 %v4334_v8  ;;  %2920 = vmatprep.subr.bf16.mxu0 %v4336_v9  ;;  %v4359_v8 = vcombine.low %v2688_v60, %v2690_v62  ;;  %v4362_v9 = vcombine.high %v2691_v4, %v2693_v5  ;;  %v4364_v10 = vcombine.high %v2692_v6, %v2694_v45 }
 0x8cc   : > { %v4363_v18 = vcombine.low %v2692_v6, %v2694_v45 }
 0x8cd   : > { %2614 = vmatmul.mubr.bf16.vlgmr.msra.gmra.mrb[32].mxu1 %v5758_v51  ;;  %2655 = vmatmul.mubr.bf16.vlgmr.msra.gmra.mrb[28].mxu0 %v5760_v52  ;;  %v4341_v51 = vcombine.low %v2671_v21, %v2673_v23  ;;  %v4343_v52 = vcombine.low %v2672_v29, %v2674_v58  ;;  %v4956_v21 = vld [vmem:[#allocation10 + $0x2c8] sm:$0xff]   ;;  %v4959_v58 = vld [vmem:[#allocation10 + $0x250] sm:$0xff]  }
 0x8ce   : > { %2878 = vmatpush1.bf16.msra.mxu1 %v4333_v12  ;;  %2921 = vmatpush1.bf16.msra.mxu0 %v4335_v13  ;;  %v4952_v12 = vld [vmem:[#allocation10 + $0x2c0] sm:$0xff]   ;;  %v4957_v23 = vld [vmem:[#allocation10 + $0x208] sm:$0xff]  }
 0x8cf   : > { %2879 = vmatprep.subr.bf16.mxu1 %v4338_v14  ;;  %2922 = vmatprep.subr.bf16.mxu0 %v4340_v19  ;;  %v4953_v13 = vld [vmem:[#allocation10 + $0x200] sm:$0xff]   ;;  %v4955_v19 = vld [vmem:[#allocation10 + $0x248] sm:$0xff]  }
 0x8d0   : > { %2909 = vmatprep.mubr.bf16.mxu1 %v5277_v0  ;;  %2952 = vmatprep.mubr.bf16.mxu0 %v5277_v0  ;;  %v4954_v14 = vld [vmem:[#allocation10 + $0x280] sm:$0xff]   ;;  %v4958_v29 = vld [vmem:[#allocation10 + $0x288] sm:$0xff]  }
 0x8d2   : > { %2880 = vmatpush1.bf16.msra.mxu1 %v4337_v20  ;;  %2923 = vmatpush1.bf16.msra.mxu0 %v4339_v61  ;;  %v4960_v20 = vld [vmem:[#allocation10 + $0x2d0] sm:$0xff]  }
 0x8d3   : > { %2881 = vmatprep.subr.bf16.mxu1 %v4342_v24  ;;  %2924 = vmatprep.subr.bf16.mxu0 %v4344_v25  ;;  %v4961_v61 = vld [vmem:[#allocation10 + $0x210] sm:$0xff]   ;;  %v4963_v25 = vld [vmem:[#allocation10 + $0x258] sm:$0xff]  }
 0x8d4   : > { %v4962_v24 = vld [vmem:[#allocation10 + $0x290] sm:$0xff]  }
 0x8d6   : > { %2882 = vmatpush1.bf16.msra.mxu1 %v4341_v51  ;;  %2925 = vmatpush1.bf16.msra.mxu0 %v4343_v52  ;;  %v4968_v51 = vld [vmem:[#allocation10 + $0x2e0] sm:$0xff]  }
 0x8d7   : > { %2883 = vmatprep.subr.bf16.mxu1 %v4346_v34  ;;  %2926 = vmatprep.subr.bf16.mxu0 %v4348_v30  ;;  %v4969_v52 = vld [vmem:[#allocation10 + $0x220] sm:$0xff]   ;;  %v4971_v30 = vld [vmem:[#allocation10 + $0x268] sm:$0xff]  }
 0x8d8   : > { %v4970_v34 = vld [vmem:[#allocation10 + $0x2a0] sm:$0xff]  }
 0x8da   : > { %2884 = vmatpush1.bf16.msra.mxu1 %v4345_v39  ;;  %2927 = vmatpush1.bf16.msra.mxu0 %v4347_v40  ;;  %v4976_v39 = vld [vmem:[#allocation10 + $0x2f0] sm:$0xff]  }
 0x8db   : > { %2885 = vmatprep.subr.bf16.mxu1 %v4350_v41  ;;  %2928 = vmatprep.subr.bf16.mxu0 %v4352_v42  ;;  %v4977_v40 = vld [vmem:[#allocation10 + $0x230] sm:$0xff]   ;;  %v4979_v42 = vld [vmem:[#allocation10 + $0x278] sm:$0xff]  }
 0x8dc   : > { %v4978_v41 = vld [vmem:[#allocation10 + $0x2b0] sm:$0xff]  }
 0x8de   : > { %2886 = vmatpush1.bf16.msra.mxu1 %v4349_v50  ;;  %2929 = vmatpush1.bf16.msra.mxu0 %v4351_v53  ;;  %v5777_v50 = vld [vmem:[#allocation8 + $0x70] sm:$0xff]  ;;  %v5779_v53 = vld [vmem:[#allocation8 + $0x38] sm:$0xff] }
 0x8df   : > { %2887 = vmatprep.subr.bf16.mxu1 %v4354_v54  ;;  %2930 = vmatprep.subr.bf16.mxu0 %v4356_v56  ;;  %v4398_v54 = vcombine.high %v5775_v49, %v5777_v50  ;;  %v5783_v56 = vld [vmem:[#allocation8 + $0x78] sm:$0xff]  ;;  %v4397_v57 = vcombine.low %v5775_v49, %v5777_v50 }
 0x8e0   : > { %v4399_v59 = vcombine.low %v5779_v53, %v5783_v56  ;;  %v4400_v60 = vcombine.high %v5779_v53, %v5783_v56 }
 0x8e2   : > { %2888 = vmatpush1.bf16.msra.mxu1 %v4353_v63  ;;  %2931 = vmatpush1.bf16.msra.mxu0 %v4355_v1 }
 0x8e3   : > { %2889 = vmatprep.subr.bf16.mxu1 %v4358_v2  ;;  %2932 = vmatprep.subr.bf16.mxu0 %v4360_v3 }
 0x8e6   : > { %2890 = vmatpush1.bf16.msra.mxu1 %v4357_v7  ;;  %2933 = vmatpush1.bf16.msra.mxu0 %v4359_v8 }
 0x8e7   : > { %2891 = vmatprep.subr.bf16.mxu1 %v4362_v9  ;;  %2934 = vmatprep.subr.bf16.mxu0 %v4364_v10 }
 0x8ea   : > { %2892 = vmatpush1.bf16.msra.mxu1 %v4361_v17  ;;  %2935 = vmatpush1.bf16.msra.mxu0 %v4363_v18 }
 0x8eb   : > { %4587 = vmatprep.subr.bf16.mxu1 %v4951_v11  ;;  %4609 = vmatprep.subr.bf16.mxu0 %v4952_v12 }
 0x8ed   : > { %2910 = vmatmul.mubr.bf16.vlgmr.msra.gmra.mrb[36].mxu1 %v5740_v44  ;;  %2953 = vmatmul.mubr.bf16.vlgmr.msra.gmra.mrb[32].mxu0 %v5740_v44 }
 0x8ee   : > { %4588 = vmatpush3.bf16.msra.mxu1 %v4953_v13  ;;  %4610 = vmatpush3.bf16.msra.mxu0 %v4954_v14 }
 0x8ef   : > { %4589 = vmatprep.subr.bf16.mxu1 %v4955_v19  ;;  %4611 = vmatprep.subr.bf16.mxu0 %v4956_v21 }
 0x8f2   : > { %4590 = vmatpush3.bf16.msra.mxu1 %v4957_v23  ;;  %4612 = vmatpush3.bf16.msra.mxu0 %v4958_v29 }
 0x8f3   : > { %4591 = vmatprep.subr.bf16.mxu1 %v4959_v58  ;;  %4613 = vmatprep.subr.bf16.mxu0 %v4960_v20 }
 0x8f6   : > { %4592 = vmatpush3.bf16.msra.mxu1 %v4961_v61  ;;  %4614 = vmatpush3.bf16.msra.mxu0 %v4962_v24 }
 0x8f7   : > { %4593 = vmatprep.subr.bf16.mxu1 %v4963_v25  ;;  %4615 = vmatprep.subr.bf16.mxu0 %v4964_v26 }
 0x8fa   : > { %4594 = vmatpush3.bf16.msra.mxu1 %v4965_v27  ;;  %4616 = vmatpush3.bf16.msra.mxu0 %v4966_v28  ;;  %v2695_v28 = vld [vmem:[%s5934_s29 + $0x8] sm:$0xf] }
 0x8fb   : > { %4595 = vmatprep.subr.bf16.mxu1 %v4967_v32  ;;  %4617 = vmatprep.subr.bf16.mxu0 %v4968_v51  ;;  %v2700_v32 = vrot.slane %v2695_v28, %v5628_v31  ;;  %v2708_v51 = vrot.slane %v2695_v28, %v5647_v48 }
 0x8fe   : > { %4596 = vmatpush3.bf16.msra.mxu1 %v4969_v52  ;;  %4618 = vmatpush3.bf16.msra.mxu0 %v4970_v34  ;;  %v2704_v52 = vrot.slane %v2695_v28, %v5634_v33  ;;  %v2712_v34 = vrot.slane %v2695_v28, %v5752_v16  ;;  %v3327_v28 = vld [vmem:[#allocation8 + $0x1b0] sm:$0xff] }
 0x8ff   : > { %4597 = vmatprep.subr.bf16.mxu1 %v4971_v30  ;;  %4619 = vmatprep.subr.bf16.mxu0 %v4972_v35 }
 0x902   : > { %4598 = vmatpush3.bf16.msra.mxu1 %v4973_v36  ;;  %4620 = vmatpush3.bf16.msra.mxu0 %v4974_v37 }
 0x903   : > { %4599 = vmatprep.subr.bf16.mxu1 %v4975_v38  ;;  %4621 = vmatprep.subr.bf16.mxu0 %v4976_v39 }
 0x906   : > { %4600 = vmatpush3.bf16.msra.mxu1 %v4977_v40  ;;  %4622 = vmatpush3.bf16.msra.mxu0 %v4978_v41 }
 0x907   : > { %4601 = vmatprep.subr.bf16.mxu1 %v4979_v42  ;;  %4623 = vmatprep.subr.bf16.mxu0 %v4980_v46 }
 0x90a   : > { %4602 = vmatpush3.bf16.msra.mxu1 %v4981_v47  ;;  %4624 = vmatpush3.bf16.msra.mxu0 %v4982_v55 }
 0x90b   : > { %3529 = vmatprep.subr.bf16.mxu1 %v4398_v54  ;;  %3572 = vmatprep.subr.bf16.mxu0 %v4400_v60 }
 0x980   : > { %v4515_v62 = vpop.f32.mrb[28].mxu1  ;;  %v4537_v63 = vpop.f32.mrb[24].mxu0 }
 0x981   : > { %v4516_v1 = vpop.f32.mrb[29].mxu1  ;;  %v4538_v2 = vpop.f32.mrb[25].mxu0 }
 0x982   : > { %v4517_v3 = vadd.f32 %v4516_v1, %v4515_v62  ;;  %v4539_v4 = vadd.f32 %v4538_v2, %v4537_v63  ;;  %v4518_v5 = vpop.f32.mrb[30].mxu1  ;;  %v4540_v6 = vpop.f32.mrb[26].mxu0 }
 0x983   : > { %v4519_v45 = vpop.f32.mrb[31].mxu1  ;;  %v4541_v7 = vpop.f32.mrb[27].mxu0 }
 0x984   : > { %v2383_v8 = vadd.f32 %v4539_v4, %v4517_v3  ;;  %v4520_v9 = vadd.f32 %v4519_v45, %v4518_v5  ;;  %v4542_v10 = vadd.f32 %v4541_v7, %v4540_v6  ;;  %v3319_v5 = vld [vmem:[#allocation8 + $0xb0] sm:$0xff] }
 0x985   : > { %v3321_v6 = vld [vmem:[#allocation8 + $0xf0] sm:$0xff] }
 0x986   : > { %v2386_v17 = vadd.f32 %v4542_v10, %v4520_v9  ;;  %v3320_v10 = vld [vmem:[#allocation8 + $0xb8] sm:$0xff] }
 0x9a0   : > { %v4559_v18 = vpop.f32.mrb[32].mxu1  ;;  %v4581_v11 = vpop.f32.mrb[28].mxu0 }
 0x9a1   : > { %v4560_v12 = vpop.f32.mrb[33].mxu1  ;;  %v4582_v13 = vpop.f32.mrb[29].mxu0 }
 0x9a2   : > { %v4561_v14 = vadd.f32 %v4560_v12, %v4559_v18  ;;  %v4583_v19 = vadd.f32 %v4582_v13, %v4581_v11  ;;  %v4562_v21 = vpop.f32.mrb[34].mxu1  ;;  %v4584_v23 = vpop.f32.mrb[30].mxu0 }
 0x9a3   : > { %v4563_v29 = vpop.f32.mrb[35].mxu1  ;;  %v4585_v58 = vpop.f32.mrb[31].mxu0 }
 0x9a4   : > { %v2616_v20 = vadd.f32 %v4561_v14, %v2383_v8  ;;  %v4564_v61 = vadd.f32 %v4563_v29, %v4562_v21  ;;  %v4586_v24 = vadd.f32 %v4585_v58, %v4584_v23  ;;  %v4402_v14 = vcombine.high %v3319_v5, %v3321_v6  ;;  %v3323_v21 = vld [vmem:[#allocation8 + $0x130] sm:$0xff]  ;;  %v3324_v29 = vld [vmem:[#allocation8 + $0x138] sm:$0xff] }
 0x9a5   : > { %v3325_v23 = vld [vmem:[#allocation8 + $0x170] sm:$0xff]  ;;  %v3326_v58 = vld [vmem:[#allocation8 + $0x178] sm:$0xff] }
 0x9a6   : > { %v5791_v25 = vadd.f32 %v4583_v19, %v2616_v20  ;;  %v2619_v26 = vadd.f32 %v4564_v61, %v2386_v17  ;;  %v3322_v17 = vld [vmem:[#allocation8 + $0xf8] sm:$0xff]  ;;  %v4401_v20 = vcombine.low %v3319_v5, %v3321_v6  ;;  %v4405_v49 = vcombine.low %v3323_v21, %v3325_v23  ;;  %v3343_v5 = vld [vmem:[#allocation8 + $0x3b0] sm:$0xff] }
 0x9a7   : > { %v4404_v19 = vcombine.high %v3320_v10, %v3322_v17  ;;  %v4403_v61 = vcombine.low %v3320_v10, %v3322_v17  ;;  %v4407_v50 = vcombine.low %v3324_v29, %v3326_v58  ;;  %v3345_v6 = vld [vmem:[#allocation8 + $0x3f0] sm:$0xff] }
 0x9a8   : > { %v5793_v27 = vadd.f32 %v4586_v24, %v2619_v26  ;;  %v4406_v24 = vcombine.high %v3323_v21, %v3325_v23  ;;  %v4408_v26 = vcombine.high %v3324_v29, %v3326_v58  ;;  %v4426_v10 = vcombine.high %v3343_v5, %v3345_v6  ;;  %v4987_v21 = vld [vmem:[#allocation10 + $0x348] sm:$0xff]  }
 0x9a9   : > { %v4988_v23 = vld [vmem:[#allocation10 + $0x3c8] sm:$0xff]  }
 0x9aa   : > { %v4989_v29 = vld [vmem:[#allocation10 + $0x308] sm:$0xff]  }
 0x9ab   : > { %v4990_v58 = vld [vmem:[#allocation10 + $0x388] sm:$0xff]  }
 0x9c0   : > { %v2911_v30 = vpop.f32.mrb[36].mxu1  ;;  %v2954_v35 = vpop.f32.mrb[32].mxu0 }
 0x9c1   : > { %v2912_v36 = vadd.f32 %v2911_v30, %v2700_v32  ;;  %v2955_v37 = vadd.f32 %v2954_v35, %v2708_v51  ;;  %v2913_v38 = vpop.f32.mrb[37].mxu1  ;;  %v2956_v39 = vpop.f32.mrb[33].mxu0  ;;  %v3334_v30 = vld [vmem:[#allocation8 + $0x278] sm:$0xff] }
 0x9c2   : > { %v2914_v40 = vadd.f32 %v2913_v38, %v2704_v52  ;;  %v2957_v41 = vadd.f32 %v2956_v39, %v2712_v34  ;;  %v2915_v42 = vpop.f32.mrb[38].mxu1  ;;  %v2958_v46 = vpop.f32.mrb[34].mxu0  ;;  %v3335_v38 = vld [vmem:[#allocation8 + $0x2b0] sm:$0xff] }
 0x9c3   : > { %v2916_v47 = vadd.f32 %v2915_v42, %v2700_v32  ;;  %v2959_v55 = vadd.f32 %v2958_v46, %v2708_v51  ;;  %v2917_v54 = vpop.f32.mrb[39].mxu1  ;;  %v2960_v60 = vpop.f32.mrb[35].mxu0  ;;  %v2963_v1 = vmax.f32 %v2912_v36, 0.0  ;;  %v2965_v2 = vmax.f32 %v2955_v37, 0.0  ;;  %v3329_v32 = vld [vmem:[#allocation8 + $0x1f0] sm:$0xff]  ;;  %v3328_v51 = vld [vmem:[#allocation8 + $0x1b8] sm:$0xff] }
 0x9c4   : > { %v2918_v62 = vadd.f32 %v2917_v54, %v2704_v52  ;;  %v2961_v63 = vadd.f32 %v2960_v60, %v2712_v34  ;;  %v2964_v45 = vmax.f32 %v2914_v40, 0.0  ;;  %v2966_v7 = vmax.f32 %v2957_v41, 0.0  ;;  %v3330_v52 = vld [vmem:[#allocation8 + $0x1f8] sm:$0xff]  ;;  %v3337_v39 = vld [vmem:[#allocation8 + $0x2f0] sm:$0xff] }
 0x9c5   : > { %v2967_v3 = vmax.f32 %v2916_v47, 0.0  ;;  %v2969_v4 = vmax.f32 %v2959_v55, 0.0  ;;  %v4410_v53 = vcombine.high %v3327_v28, %v3329_v32  ;;  %v4412_v56 = vcombine.high %v3328_v51, %v3330_v52  ;;  %v3332_v34 = vld [vmem:[#allocation8 + $0x238] sm:$0xff]  ;;  %v3339_v54 = vld [vmem:[#allocation8 + $0x330] sm:$0xff] }
 0x9c6   : > { %v2968_v8 = vmax.f32 %v2918_v62, 0.0  ;;  %v2970_v9 = vmax.f32 %v2961_v63, 0.0  ;;  %v4409_v35 = vcombine.low %v3327_v28, %v3329_v32  ;;  %v4411_v36 = vcombine.low %v3328_v51, %v3330_v52  ;;  %v3336_v40 = vld [vmem:[#allocation8 + $0x2b8] sm:$0xff]  ;;  %v3341_v60 = vld [vmem:[#allocation8 + $0x370] sm:$0xff]  ;;  %v4999_v52 = vld [vmem:[#allocation10 + $0x360] sm:$0xff]  }
 0x9c7   : > { %v2971_v18 = vpack.c.bf16 %v2967_v3, %v2963_v1  ;;  %v2973_v11 = vpack.c.bf16 %v2969_v4, %v2965_v2  ;;  %v3338_v41 = vld [vmem:[#allocation8 + $0x2f8] sm:$0xff]  ;;  %v4415_v46 = vcombine.low %v3332_v34, %v3334_v30  ;;  %v4418_v47 = vcombine.high %v3335_v38, %v3337_v39 }
 0x9c8   : > { %v2972_v12 = vpack.c.bf16 %v2968_v8, %v2964_v45  ;;  %v2974_v13 = vpack.c.bf16 %v2970_v9, %v2966_v7  ;;  %v4420_v55 = vcombine.high %v3336_v40, %v3338_v41  ;;  %v3340_v62 = vld [vmem:[#allocation8 + $0x338] sm:$0xff]  ;;  %v4417_v1 = vcombine.low %v3335_v38, %v3337_v39 }
 0x9c9   : > { %v3342_v63 = vld [vmem:[#allocation8 + $0x378] sm:$0xff]  ;;  %v4419_v2 = vcombine.low %v3336_v40, %v3338_v41  ;;  %v4422_v3 = vcombine.high %v3339_v54, %v3341_v60  ;;  %v4421_v8 = vcombine.low %v3339_v54, %v3341_v60 }
 0x9ca   : > { %3263 = vmatprep.mubr.bf16.mxu1 %v2972_v12  ;;  %3304 = vmatprep.mubr.bf16.mxu0 %v2974_v13  ;;  %v4424_v4 = vcombine.high %v3340_v62, %v3342_v63  ;;  %v3344_v45 = vld [vmem:[#allocation8 + $0x3b8] sm:$0xff]  ;;  %v4423_v9 = vcombine.low %v3340_v62, %v3342_v63  ;;  %v4983_v12 = vld [vmem:[#allocation10 + $0x340] sm:$0xff]  }
 0x9cb   : > { %3264 = vmatmul.mubr.bf16.vlgmr.msra.gmra.mrb[40].mxu1 %v2971_v18  ;;  %3305 = vmatmul.mubr.bf16.vlgmr.msra.gmra.mrb[36].mxu0 %v2973_v11  ;;  %v3346_v7 = vld [vmem:[#allocation8 + $0x3f8] sm:$0xff]  ;;  %v4425_v18 = vcombine.low %v3343_v5, %v3345_v6  ;;  %v4984_v13 = vld [vmem:[#allocation10 + $0x3c0] sm:$0xff]  }
 0x9cc   : > { %3530 = vmatpush1.bf16.msra.mxu1 %v4397_v57  ;;  %3573 = vmatpush1.bf16.msra.mxu0 %v4399_v59  ;;  %v3331_v57 = vld [vmem:[#allocation8 + $0x230] sm:$0xff]  ;;  %v4428_v17 = vcombine.high %v3344_v45, %v3346_v7  ;;  %v4427_v11 = vcombine.low %v3344_v45, %v3346_v7  ;;  %v4996_v28 = vld [vmem:[#allocation10 + $0x3d8] sm:$0xff]  }
 0x9cd   : > { %3531 = vmatprep.subr.bf16.mxu1 %v4402_v14  ;;  %3574 = vmatprep.subr.bf16.mxu0 %v4404_v19  ;;  %v3333_v59 = vld [vmem:[#allocation8 + $0x270] sm:$0xff]  ;;  %v4985_v14 = vld [vmem:[#allocation10 + $0x300] sm:$0xff]   ;;  %v4997_v32 = vld [vmem:[#allocation10 + $0x318] sm:$0xff]  }
 0x9ce   : > { %3561 = vmatprep.mubr.bf16.mxu1 %v5277_v0  ;;  %3604 = vmatprep.mubr.bf16.mxu0 %v5277_v0  ;;  %v4414_v37 = vcombine.high %v3331_v57, %v3333_v59  ;;  %v4416_v0 = vcombine.high %v3332_v34, %v3334_v30  ;;  %v4413_v42 = vcombine.low %v3331_v57, %v3333_v59  ;;  %v4986_v19 = vld [vmem:[#allocation10 + $0x380] sm:$0xff]   ;;  %v4998_v51 = vld [vmem:[#allocation10 + $0x398] sm:$0xff]   ;;  %v5004_v57 = vld [vmem:[#allocation10 + $0x3e8] sm:$0xff]  }
 0x9cf   : > { %v5005_v59 = vld [vmem:[#allocation10 + $0x328] sm:$0xff]   ;;  %v5007_v30 = vld [vmem:[#allocation10 + $0x370] sm:$0xff]   ;;  %v5012_v38 = vld [vmem:[#allocation10 + $0x3f8] sm:$0xff]  }
 0x9d0   : > { %3532 = vmatpush1.bf16.msra.mxu1 %v4401_v20  ;;  %3575 = vmatpush1.bf16.msra.mxu0 %v4403_v61  ;;  %v4991_v20 = vld [vmem:[#allocation10 + $0x350] sm:$0xff]   ;;  %v5006_v34 = vld [vmem:[#allocation10 + $0x3a8] sm:$0xff]   ;;  %v5013_v39 = vld [vmem:[#allocation10 + $0x338] sm:$0xff]  }
 0x9d1   : > { %3533 = vmatprep.subr.bf16.mxu1 %v4406_v24  ;;  %3576 = vmatprep.subr.bf16.mxu0 %v4408_v26  ;;  %v4992_v61 = vld [vmem:[#allocation10 + $0x3d0] sm:$0xff]   ;;  %v4995_v26 = vld [vmem:[#allocation10 + $0x358] sm:$0xff]  }
 0x9d2   : > { %v4993_v24 = vld [vmem:[#allocation10 + $0x310] sm:$0xff]   ;;  %v5014_v40 = vld [vmem:[#allocation10 + $0x3b8] sm:$0xff]  }
 0x9d3   : > { %v3347_v7 = vld [vmem:[%s5934_s29 + $0xc] sm:$0xf] }
 0x9d4   : > { %3534 = vmatpush1.bf16.msra.mxu1 %v4405_v49  ;;  %3577 = vmatpush1.bf16.msra.mxu0 %v4407_v50  ;;  %v5000_v49 = vld [vmem:[#allocation10 + $0x3e0] sm:$0xff]  }
 0x9d5   : > { %3535 = vmatprep.subr.bf16.mxu1 %v4410_v53  ;;  %3578 = vmatprep.subr.bf16.mxu0 %v4412_v56  ;;  %v5001_v50 = vld [vmem:[#allocation10 + $0x320] sm:$0xff]   ;;  %v5003_v56 = vld [vmem:[#allocation10 + $0x368] sm:$0xff]  }
 0x9d6   : > { %v5002_v53 = vld [vmem:[#allocation10 + $0x3a0] sm:$0xff]  }
 0x9d8   : > { %3536 = vmatpush1.bf16.msra.mxu1 %v4409_v35  ;;  %3579 = vmatpush1.bf16.msra.mxu0 %v4411_v36  ;;  %v5008_v35 = vld [vmem:[#allocation10 + $0x3f0] sm:$0xff]  }
 0x9d9   : > { %3537 = vmatprep.subr.bf16.mxu1 %v4414_v37  ;;  %3580 = vmatprep.subr.bf16.mxu0 %v4416_v0  ;;  %v5009_v36 = vld [vmem:[#allocation10 + $0x330] sm:$0xff]   ;;  %v5011_v0 = vld [vmem:[#allocation10 + $0x378] sm:$0xff]  }
 0x9da   : > { %v5010_v37 = vld [vmem:[#allocation10 + $0x3b0] sm:$0xff]  }
 0x9dc   : > { %3538 = vmatpush1.bf16.msra.mxu1 %v4413_v42  ;;  %3581 = vmatpush1.bf16.msra.mxu0 %v4415_v46 }
 0x9dd   : > { %3539 = vmatprep.subr.bf16.mxu1 %v4418_v47  ;;  %3582 = vmatprep.subr.bf16.mxu0 %v4420_v55 }
 0x9e0   : > { %3540 = vmatpush1.bf16.msra.mxu1 %v4417_v1  ;;  %3583 = vmatpush1.bf16.msra.mxu0 %v4419_v2 }
 0x9e1   : > { %3541 = vmatprep.subr.bf16.mxu1 %v4422_v3  ;;  %3584 = vmatprep.subr.bf16.mxu0 %v4424_v4 }
 0x9e4   : > { %3542 = vmatpush1.bf16.msra.mxu1 %v4421_v8  ;;  %3585 = vmatpush1.bf16.msra.mxu0 %v4423_v9  ;;  %v3352_v8 = vrot.slane %v3347_v7, %v5628_v31  ;;  %v3360_v9 = vrot.slane %v3347_v7, %v5647_v48 }
 0x9e5   : > { %3543 = vmatprep.subr.bf16.mxu1 %v4426_v10  ;;  %3586 = vmatprep.subr.bf16.mxu0 %v4428_v17  ;;  %v3356_v10 = vrot.slane %v3347_v7, %v5634_v33  ;;  %v3364_v17 = vrot.slane %v3347_v7, %v5752_v16 }
 0x9e8   : > { %3544 = vmatpush1.bf16.msra.mxu1 %v4425_v18  ;;  %3587 = vmatpush1.bf16.msra.mxu0 %v4427_v11 }
 0x9e9   : > { %4631 = vmatprep.subr.bf16.mxu1 %v4983_v12  ;;  %4653 = vmatprep.subr.bf16.mxu0 %v4984_v13 }
 0x9eb   : > { %3562 = vmatmul.mubr.bf16.vlgmr.msra.gmra.mrb[44].mxu1 %v5740_v44  ;;  %3605 = vmatmul.mubr.bf16.vlgmr.msra.gmra.mrb[40].mxu0 %v5740_v44  ;;  %v4994_v44 = vld [vmem:[#allocation10 + $0x390] sm:$0xff]  }
 0x9ec   : > { %4632 = vmatpush3.bf16.msra.mxu1 %v4985_v14  ;;  %4654 = vmatpush3.bf16.msra.mxu0 %v4986_v19 }
 0x9ed   : > { %4633 = vmatprep.subr.bf16.mxu1 %v4987_v21  ;;  %4655 = vmatprep.subr.bf16.mxu0 %v4988_v23 }
 0x9f0   : > { %4634 = vmatpush3.bf16.msra.mxu1 %v4989_v29  ;;  %4656 = vmatpush3.bf16.msra.mxu0 %v4990_v58 }
 0x9f1   : > { %4635 = vmatprep.subr.bf16.mxu1 %v4991_v20  ;;  %4657 = vmatprep.subr.bf16.mxu0 %v4992_v61 }
 0x9f4   : > { %4636 = vmatpush3.bf16.msra.mxu1 %v4993_v24  ;;  %4658 = vmatpush3.bf16.msra.mxu0 %v4994_v44 }
 0x9f5   : > { %4637 = vmatprep.subr.bf16.mxu1 %v4995_v26  ;;  %4659 = vmatprep.subr.bf16.mxu0 %v4996_v28 }
 0x9f8   : > { %4638 = vmatpush3.bf16.msra.mxu1 %v4997_v32  ;;  %4660 = vmatpush3.bf16.msra.mxu0 %v4998_v51 }
 0x9f9   : > { %4639 = vmatprep.subr.bf16.mxu1 %v4999_v52  ;;  %4661 = vmatprep.subr.bf16.mxu0 %v5000_v49 }
 0x9fc   : > { %4640 = vmatpush3.bf16.msra.mxu1 %v5001_v50  ;;  %4662 = vmatpush3.bf16.msra.mxu0 %v5002_v53 }
 0x9fd   : > { %4641 = vmatprep.subr.bf16.mxu1 %v5003_v56  ;;  %4663 = vmatprep.subr.bf16.mxu0 %v5004_v57 }
 0xa00   : > { %4642 = vmatpush3.bf16.msra.mxu1 %v5005_v59  ;;  %4664 = vmatpush3.bf16.msra.mxu0 %v5006_v34 }
 0xa01   : > { %4643 = vmatprep.subr.bf16.mxu1 %v5007_v30  ;;  %4665 = vmatprep.subr.bf16.mxu0 %v5008_v35 }
 0xa04   : > { %4644 = vmatpush3.bf16.msra.mxu1 %v5009_v36  ;;  %4666 = vmatpush3.bf16.msra.mxu0 %v5010_v37 }
 0xa05   : > { %4645 = vmatprep.subr.bf16.mxu1 %v5011_v0  ;;  %4667 = vmatprep.subr.bf16.mxu0 %v5012_v38 }
 0xa08   : > { %4646 = vmatpush3.bf16.msra.mxu1 %v5013_v39  ;;  %4668 = vmatpush3.bf16.msra.mxu0 %v5014_v40 }
 0xa9e   : > { %v4603_v41 = vpop.f32.mrb[40].mxu1  ;;  %v4625_v42 = vpop.f32.mrb[36].mxu0 }
 0xa9f   : > { %v4604_v46 = vpop.f32.mrb[41].mxu1  ;;  %v4626_v47 = vpop.f32.mrb[37].mxu0 }
 0xaa0   : > { %v4605_v55 = vadd.f32 %v4604_v46, %v4603_v41  ;;  %v4627_v54 = vadd.f32 %v4626_v47, %v4625_v42  ;;  %v4606_v60 = vpop.f32.mrb[42].mxu1  ;;  %v4628_v62 = vpop.f32.mrb[38].mxu0  ;;  %v4461_v42 = vld [vmem:[%s5935_s10] ss:$0 sm:$0xff]  ;;  %s4023_s10 = scalar_lea.sflag [#allocation4], %s5579_s18 }
 0xaa1   : > { %v4607_v63 = vpop.f32.mrb[43].mxu1  ;;  %v4629_v1 = vpop.f32.mrb[39].mxu0 }
 0xaa2   : > { %v3307_v2 = vadd.f32 %v4627_v54, %v4605_v55  ;;  %v4608_v3 = vadd.f32 %v4607_v63, %v4606_v60  ;;  %v4630_v4 = vadd.f32 %v4629_v1, %v4628_v62 }
 0xaa4   : > { %v3313_v5 = vadd.f32 %v3307_v2, %v5791_v25  ;;  %v3310_v6 = vadd.f32 %v4630_v4, %v4608_v3 }
 0xaa6   : > { %v3314_v45 = vadd.f32 %v3310_v6, %v5793_v27 }
 0xabe   : > { %v3563_v18 = vpop.f32.mrb[44].mxu1  ;;  %v3606_v11 = vpop.f32.mrb[40].mxu0 }
 0xabf   : > { %v3564_v12 = vadd.f32 %v3563_v18, %v3352_v8  ;;  %v3607_v13 = vadd.f32 %v3606_v11, %v3360_v9  ;;  %v3565_v25 = vpop.f32.mrb[45].mxu1  ;;  %v3608_v14 = vpop.f32.mrb[41].mxu0 }
 0xac0   : > { %v3566_v19 = vadd.f32 %v3565_v25, %v3356_v10  ;;  %v3609_v27 = vadd.f32 %v3608_v14, %v3364_v17  ;;  %v3567_v21 = vpop.f32.mrb[46].mxu1  ;;  %v3610_v23 = vpop.f32.mrb[42].mxu0  ;;  %v4463_v14 = vld [vmem:[%s5937_s22] ss:$0 sm:$0xff] }
 0xac1   : > { %v3568_v29 = vadd.f32 %v3567_v21, %v3352_v8  ;;  %v3611_v58 = vadd.f32 %v3610_v23, %v3360_v9  ;;  %v3569_v20 = vpop.f32.mrb[47].mxu1  ;;  %v3612_v31 = vpop.f32.mrb[43].mxu0  ;;  %v3615_v24 = vmax.f32 %v3564_v12, 0.0  ;;  %v3617_v33 = vmax.f32 %v3607_v13, 0.0  ;;  %v4462_v13 = vld [vmem:[%s5936_s16] ss:$0 sm:$0xff] }
 0xac2   : > { %v3570_v61 = vadd.f32 %v3569_v20, %v3356_v10  ;;  %v3613_v48 = vadd.f32 %v3612_v31, %v3364_v17  ;;  %v3616_v26 = vmax.f32 %v3566_v19, 0.0  ;;  %v3618_v28 = vmax.f32 %v3609_v27, 0.0 }
 0xac3   : > { %v3619_v44 = vmax.f32 %v3568_v29, 0.0  ;;  %v3621_v16 = vmax.f32 %v3611_v58, 0.0 }
 0xac4   : > { %v3620_v32 = vmax.f32 %v3570_v61, 0.0  ;;  %v3622_v51 = vmax.f32 %v3613_v48, 0.0 }
 0xac5   : > { %v3623_v52 = vpack.c.bf16 %v3619_v44, %v3615_v24  ;;  %v3625_v49 = vpack.c.bf16 %v3621_v16, %v3617_v33 }
 0xac6   : > { %v3624_v50 = vpack.c.bf16 %v3620_v32, %v3616_v26  ;;  %v3626_v53 = vpack.c.bf16 %v3622_v51, %v3618_v28 }
 0xac8   : > { %3915 = vmatprep.mubr.bf16.mxu1 %v3624_v50  ;;  %3956 = vmatprep.mubr.bf16.mxu0 %v3626_v53 }
 0xac9   : > { %3916 = vmatmul.mubr.bf16.vlgmr.msra.gmra.mrb[48].mxu1 %v3623_v52  ;;  %3957 = vmatmul.mubr.bf16.vlgmr.msra.gmra.mrb[44].mxu0 %v3625_v49 }
 0xb9c   : > { %v4647_v56 = vpop.f32.mrb[48].mxu1  ;;  %v4669_v57 = vpop.f32.mrb[44].mxu0 }
 0xb9d   : > { %v4648_v59 = vpop.f32.mrb[49].mxu1  ;;  %v4670_v34 = vpop.f32.mrb[45].mxu0 }
 0xb9e   : > { %v4649_v30 = vadd.f32 %v4648_v59, %v4647_v56  ;;  %v4671_v35 = vadd.f32 %v4670_v34, %v4669_v57  ;;  %v4650_v36 = vpop.f32.mrb[50].mxu1  ;;  %v4672_v37 = vpop.f32.mrb[46].mxu0 }
 0xb9f   : > { %v4651_v0 = vpop.f32.mrb[51].mxu1  ;;  %v4673_v38 = vpop.f32.mrb[47].mxu0 }
 0xba0   : > { %v3959_v39 = vadd.f32 %v4671_v35, %v4649_v30  ;;  %v4652_v40 = vadd.f32 %v4651_v0, %v4650_v36  ;;  %v4674_v41 = vadd.f32 %v4673_v38, %v4672_v37 }
 0xba2   : > { %v3965_v46 = vadd.f32 %v3959_v39, %v3313_v5  ;;  %v3962_v47 = vadd.f32 %v4674_v41, %v4652_v40 }
 0xba4   : > { %v3966_v55 = vadd.f32 %v3962_v47, %v3314_v45  ;;  %v3974_v54 = vadd.f32 %v4461_v42, %v3965_v46 }
 0xba6   : > { %v3976_v60 = vadd.f32 %v3974_v54, %v5734_v43  ;;  %v3975_v62 = vadd.f32 %v4461_v42, %v3966_v55 }
 0xba8   : > { %3980 = vadd.xlane.f32.xlu1 %v3976_v60  ;;  %v3977_v63 = vadd.f32 %v3975_v62, %v5736_v22 }
 0xbaa   : > { %3982 = vadd.xlane.f32.xlu0 %v3977_v63 }
 0xc35   : > { %v3981_v1 = vpop.xlane.xlu1 %3980 }
 0xc36   : > { %v3984_v2 = vmul.f32 0.010416667, %v3981_v1 }
 0xc37   : > { %v3983_v3 = vpop.xlane.xlu0 %3982 }
 0xc38   : > { %v3986_v4 = vsub.f32 %v3976_v60, %v3984_v2  ;;  %v3985_v6 = vmul.f32 0.010416667, %v3983_v3 }
 0xc3a   : > { %v3987_v7 = vsub.f32 %v3977_v63, %v3985_v6  ;;  %v3988_v8 = vmul.f32 %v5714_v15, %v3986_v4 }
 0xc3c   : > { %v3990_v9 = vmul.f32 %v3988_v8, %v3988_v8  ;;  %v3989_v5 = vmul.f32 %v5714_v15, %v3987_v7 }
 0xc3e   : > { %3992 = vadd.xlane.f32.xlu1 %v3990_v9  ;;  %v3991_v45 = vmul.f32 %v3989_v5, %v3989_v5 }
 0xc40   : > { %3994 = vadd.xlane.f32.xlu0 %v3991_v45 }
 0xccb   : > { %v3993_v43 = vpop.xlane.xlu1 %3992 }
 0xccc   : > { %v3996_v10 = vmul.f32 0.010416667, %v3993_v43 }
 0xccd   : > { %v3995_v22 = vpop.xlane.xlu0 %3994 }
 0xcce   : > { %v3998_v17 = vadd.f32 1e-05, %v3996_v10  ;;  %v3997_v18 = vmul.f32 0.010416667, %v3995_v22 }
 0xcd0   : > { %5043 = vrsqrt.f32 %v3998_v17  ;;  %v3999_v11 = vadd.f32 1e-05, %v3997_v18 }
 0xcd2   : > { %5045 = vrsqrt.f32 %v3999_v11 }
 0xcda   : > { %v5044_v12 = vpop.eup %5043 }
 0xcdb   : > { %v4002_v15 = vmul.f32 %v5044_v12, %v3988_v8 }
 0xcdc   : > { %v5046_v25 = vpop.eup %5045 }
 0xcdd   : > { %v4010_v19 = vmul.f32 %v4462_v13, %v4002_v15  ;;  %v4003_v27 = vmul.f32 %v5046_v25, %v3989_v5 }
 0xcdf   : > { %v4018_v21 = vadd.f32 %v4463_v14, %v4010_v19  ;;  %v4011_v23 = vmul.f32 %v4462_v13, %v4003_v27 }
 0xce1   : > { %v4019_v29 = vadd.f32 %v4463_v14, %v4011_v23  ;;  %4020 = vst [vmem:[%s570_s15] sm:$0xff] %v4018_v21 }
 0xce3   : > { %4021 = vst [vmem:[%s570_s15 + $0x8] sm:$0xff] %v4019_v29 }
 0xce4   : > { %5202 = shalt.err (!%p5199_p13)
}
 0xce5   : > { %s5203_s16 = scalar_lea.hbm %s5840_s11, 256  ;;  %s5207_s22 = scalar_lea.hbm %s5938_s12, 512 }
 0xce6   : > { %p5204_p9 = scmp.ne.s32.totalorder %s5840_s11, %s5203_s16  ;;  %p5208_p4 = scmp.lt.u32.totalorder %s5840_s11, %s5938_s12 }
 0xce7   : > { %p5209_p8 = scmp.lt.u32.totalorder %s5207_s22, %s5203_s16  ;;  %p5211_p10 = scmp.lt.u32.totalorder %s5203_s16, %s5840_s11 }
 0xce8   : > { %p5205_p0 = pnand %p5204_p9, %p5531_p5 }
 0xce9   : > { %p5210_p6 = por %p5209_p8, %p5208_p4 }
 0xcea   : > { %p5206_p11 = pneg %p5205_p0 }
 0xceb   : > { %p5212_p3 = por %p5211_p10, %p5210_p6 }
 0xced   : > { %p5213_p7 = pnand %p5212_p3, %p5206_p11 }
 0xcef   : > { %5216 = shalt.err (!%p5213_p7)
}
 0xcf0   : > { %s5284_s25 = smov 128   ;;  %s5285_s28 = smov 8  }
 0xcf1   : > { %4765 = dma.vmem_to_hbm [thread:$0]  (%p5531_p5), %s5842_s17, 256, %s5840_s11, %s4023_s10, %s5284_s25, %s5284_s25, %s5285_s28  }
 0xcf2 PF: > { %s5939_s13 = sld [smem:[#allocation16_spill]]  ;;  %s5940_s26 = sld [smem:[#allocation17_spill]] }
 0xcf3   : > { %p5942_p2 = scmp.ge.s32.totalorder %s5263_s21, 2 }
 0xcf8   : > { %s4051_s14 = sand.u32 1, %s5939_s13   ;;  %p5941_p12 = scmp.ne.s32.totalorder %s5940_s26, 0 }
 0xcf9   : > { %s4052_s1 = scalar_lea.sflag [#allocation4], %s4051_s14 }
 0xcfa   : > { %p4785_p1 = pnand %p5942_p2, %p5941_p12 }
 0xcfc   : > { %5246 = dma.done.wait (!%p4785_p1), %s4052_s1, 256  }
 0xcfd   : > { %5248 = vsyncadd (!%p4785_p1), %s4052_s1, 4294967040  ;;  %p30_p13 = scmp.ge.s32.totalorder %s5517_s23, 4   ;;  %s5943_s18 = smov %s5255_s19 }
 0xcfe   : > { %s5944_s19 = smov %s5259_s20  ;;  %s5945_s20 = smov %s5527_s6 }
 0xcff   : > { %s5946_s21 = smov %s5517_s23  ;;  %32 = sbr.rel (!%p30_p13) target bundleno = 15 (0xf), region = 141 }
 0xd06   :  { %4057 = vsyncpa [#allocation3], 1 }
 0xd07   :  { %4059 = vsyncpa [#allocation3 + $0x1], 1 }
 0xd08   :  { %4060 = vsyncpa [#allocation6], 1 }
 0xd09   :  { %4061 = vsyncpa [#allocation9], 1 }
 0xd0a   :  { %4062 = vsyncpa [#allocation4], 1 }
 0xd0b   :  { %4064 = vsyncpa [#allocation4 + $0x1], 1 }

</bundles_post_ra>
